<compile_context>
chip_gen: v7x
topology: tpu7x:2x2x1
jax: 0.10.0
libtpu: 0.0.40
codegen_flags: <defaults>
</compile_context>

<pallas_src>
import functools

import jax
import jax.numpy as jnp
from jax.experimental import pallas as pl
from jax.experimental.pallas import tpu as pltpu


def _conv_bn_relu_kernel(w_ref, p_ref, b_ref, o_ref):
    # MXU matmul: (C_out, K_pad) @ (K_pad, TM) -> (C_out, TM), f32 accumulation.
    acc = jnp.dot(w_ref[...], p_ref[0], preferred_element_type=jnp.float32)
    # Folded conv-bias + BatchNorm bias, then ReLU.  TM is a multiple of 128,
    # so the store is lane-dense (full, unmasked vsts) even for small C_out.
    o_ref[0] = jnp.maximum(acc + b_ref[...], 0.0).astype(o_ref.dtype)


def _vmem_budget_bytes():
    """Per-generation VMEM budget for tile sizing (and the scoped limit)."""
    try:
        phys = pltpu.get_tpu_info().vmem_capacity_bytes
    except Exception:
        phys = 64 * 1024 * 1024          # conservative fallback: v7x per-core VMEM
    # ~48 MB on v7x (64 MiB physical), ~96 MB on v5e/v6e (128 MiB physical).
    return min(int(phys * 3 // 4), 96 * 1024 * 1024)


def _pick_tile_m(Mn, n_batch, k_pad, c_out, patch_bytes, vmem_budget,
                 max_tm=4096):
    """Largest lane-dense tile TM <= max_tm that fits the VMEM budget.

    Budget per TM element: double-buffered patches + double-buffered f32
    output (weight/bias are tiny and resident).  Prefers a TM that divides
    Mn exactly (no padded copy of the big patch array) with an even total
    grid-step count >= 2 (v7x megacore balance).
    """
    bytes_per_m = 2 * k_pad * patch_bytes + 2 * c_out * 4
    cap = max(128, (vmem_budget // bytes_per_m) // 128 * 128)
    max_tm = min(max_tm, cap)
    fallback = None
    for tm in range(max_tm, 127, -128):
        if Mn % tm == 0:
            steps = n_batch * (Mn // tm)
            if steps >= 2 and steps % 2 == 0:
                return tm, Mn
            if fallback is None:
                fallback = tm
    if fallback is not None:
        return fallback, Mn
    tm = min(max_tm, 512)
    return tm, ((Mn + tm - 1) // tm) * tm


def _im2col_3d(x, k, s, p, k_pad, compute_dtype):
    """x: (N, Cin, D, H, W) -> patches (N, K_pad, Do*Ho*Wo) in compute_dtype.

    K ordering is (ci, kd, kh, kw), matching PyTorch's (C_out, C_in, kD, kH, kW)
    weight layout flattened row-major.  Single low-precision pass: cast first
    (halves im2col HBM traffic), pad once, stack the k^3 shifted views, reshape
    straight into the N-major layout the kernel consumes (no transpose), and
    fold in the K padding.
    """
    N, Cin, D, H, W = x.shape
    x = x.astype(compute_dtype)
    xp = jnp.pad(x, ((0, 0), (0, 0), (p, p), (p, p), (p, p)))
    Do = (D + 2 * p - k) // s + 1
    Ho = (H + 2 * p - k) // s + 1
    Wo = (W + 2 * p - k) // s + 1
    cols = []
    for kd in range(k):
        for kh in range(k):
            for kw in range(k):
                cols.append(xp[:, :,
                               kd:kd + s * Do:s,
                               kh:kh + s * Ho:s,
                               kw:kw + s * Wo:s])        # (N, Cin, Do, Ho, Wo)
    pat = jnp.stack(cols, axis=2)                        # (N, Cin, k^3, Do, Ho, Wo)
    pat = pat.reshape(N, Cin * k * k * k, Do * Ho * Wo)  # N-major, no transpose
    K = Cin * k * k * k
    if k_pad != K:
        pat = jnp.pad(pat, ((0, 0), (0, k_pad - K), (0, 0)))
    return pat, (Do, Ho, Wo)


@functools.partial(jax.jit, static_argnames=("k", "s", "p", "compute_dtype"))
def conv3d_bn_relu(x, weight, conv_bias, gamma, beta, run_mean, run_var,
                   *, k, s, p, eps=1e-5, compute_dtype=jnp.bfloat16):
    """Equivalent of Conv3d(in,out,k,s,p) -> BatchNorm3d(eval) -> ReLU.

    x      : (N, C_in, D, H, W)      float32
    weight : (C_out, C_in, k, k, k)  float32  (PyTorch layout)
    returns: (N, C_out, Do, Ho, Wo)  float32
    """
    N, Cin, D, H, W = x.shape
    Cout = weight.shape[0]
    K = Cin * k * k * k

    # Pad the contraction dim only to the compute dtype's sublane pack
    # (16 for bf16, 8 for f32); K sits on a full (untiled) block dim so
    # 128-alignment is unnecessary dead traffic on the patch stream.
    pack = 32 // (8 * jnp.dtype(compute_dtype).itemsize) * 8
    K_pad = ((K + pack - 1) // pack) * pack

    patches, (Do, Ho, Wo) = _im2col_3d(x, k, s, p, K_pad, compute_dtype)
    Mn = Do * Ho * Wo                                    # per-sample spatial size

    # Fold conv bias + inference BatchNorm (fold in f32, then cast).
    scale = gamma / jnp.sqrt(run_var + eps)              # (C_out,)
    bias = (conv_bias - run_mean) * scale + beta         # (C_out,)
    w_mat = weight.reshape(Cout, K) * scale[:, None]     # (C_out, K)
    if K_pad != K:
        w_mat = jnp.pad(w_mat, ((0, 0), (0, K_pad - K)))
    w_mat = w_mat.astype(compute_dtype)
    bias2 = bias.reshape(Cout, 1).astype(jnp.float32)

    vmem_budget = _vmem_budget_bytes()
    TM, Mn_pad = _pick_tile_m(Mn, N, K_pad, Cout,
                              jnp.dtype(compute_dtype).itemsize, vmem_budget)
    if Mn_pad != Mn:
        patches = jnp.pad(patches, ((0, 0), (0, 0), (0, Mn_pad - Mn)))

    # (pipeline_mode=pl.Buffered(3) on the patches spec only if a trace shows
    #  exposed input DMA; larger TM is the first lever.)
    out = pl.pallas_call(
        _conv_bn_relu_kernel,
        out_shape=jax.ShapeDtypeStruct((N, Cout, Mn_pad), jnp.float32),
        grid=(N, Mn_pad // TM),
        in_specs=[
            pl.BlockSpec((Cout, K_pad), lambda n, i: (0, 0)),      # resident weight
            pl.BlockSpec((1, K_pad, TM), lambda n, i: (n, 0, i)),  # streamed patches
            pl.BlockSpec((Cout, 1), lambda n, i: (0, 0)),          # folded bias
        ],
        out_specs=pl.BlockSpec((1, Cout, TM), lambda n, i: (n, 0, i)),
        compiler_params=pltpu.CompilerParams(
            dimension_semantics=("parallel", "parallel"),
            vmem_limit_bytes=vmem_budget),
    )(w_mat, patches, bias2)

    # Output is already N-major: a reshape is enough, no transpose.
    return out[:, :, :Mn].reshape(N, Cout, Do, Ho, Wo)


if __name__ == "__main__":
    # Module config: Conv3d(in=4, out=8, k=3, s=1, p=1) + BatchNorm3d + ReLU
    Cin, Cout, k, s, p = 4, 8, 3, 1, 1
    N, D, H, W = 2, 16, 16, 16

    key = jax.random.PRNGKey(0)
    kx, kw, kb, kg, kbt, km, kv = jax.random.split(key, 7)

    x = jax.random.normal(kx, (N, Cin, D, H, W), dtype=jnp.float32)
    weight = jax.random.normal(kw, (Cout, Cin, k, k, k), dtype=jnp.float32) * 0.1
    conv_bias = jax.random.normal(kb, (Cout,), dtype=jnp.float32) * 0.1
    gamma = 1.0 + 0.1 * jax.random.normal(kg, (Cout,), dtype=jnp.float32)
    beta = 0.1 * jax.random.normal(kbt, (Cout,), dtype=jnp.float32)
    run_mean = 0.1 * jax.random.normal(km, (Cout,), dtype=jnp.float32)
    run_var = 0.5 + jax.random.uniform(kv, (Cout,), dtype=jnp.float32)

    # Reference (same semantics as nn.Conv3d -> BatchNorm3d(eval) -> ReLU).
    ref = jax.lax.conv_general_dilated(
        x, weight, window_strides=(s, s, s), padding=[(p, p)] * 3,
        dimension_numbers=("NCDHW", "OIDHW", "NCDHW"))
    ref = ref + conv_bias.reshape(1, Cout, 1, 1, 1)
    r_scale = gamma / jnp.sqrt(run_var + 1e-5)
    ref = (ref - run_mean.reshape(1, Cout, 1, 1, 1)) * r_scale.reshape(1, Cout, 1, 1, 1) \
        + beta.reshape(1, Cout, 1, 1, 1)
    ref = jnp.maximum(ref, 0.0)

    # f32 path: tight numerical check.
    out_f32 = conv3d_bn_relu(x, weight, conv_bias, gamma, beta, run_mean,
                             run_var, k=k, s=s, p=p,
                             compute_dtype=jnp.float32)
    out_f32 = jax.block_until_ready(out_f32)
    assert out_f32.shape == (N, Cout, D, H, W), out_f32.shape
    err32 = float(jnp.max(jnp.abs(out_f32 - ref)))
    assert err32 < 2e-3, err32

    # bf16 MXU path (default): looser tolerance for bf16 input rounding,
    # accumulation stays f32.
    out_bf16 = conv3d_bn_relu(x, weight, conv_bias, gamma, beta, run_mean,
                              run_var, k=k, s=s, p=p)
    out_bf16 = jax.block_until_ready(out_bf16)
    assert out_bf16.shape == (N, Cout, D, H, W), out_bf16.shape
    err16 = float(jnp.max(jnp.abs(out_bf16 - ref)))
    assert err16 < 5e-2, err16

    print("KERNEL_OK")
</pallas_src>

<mosaic_0001>
module attributes {stable_mosaic.version = 11 : i64} {
  func.func @_conv_bn_relu_kernel(%arg0: i32, %arg1: i32, %arg2: memref<8x112xf32, #tpu.memory_space<vmem>>, %arg3: memref<1x112x4096xf32, #tpu.memory_space<vmem>>, %arg4: memref<8x1xf32, #tpu.memory_space<vmem>>, %arg5: memref<1x8x4096xf32, #tpu.memory_space<vmem>>) attributes {dimension_semantics = [#tpu.dimension_semantics<parallel>, #tpu.dimension_semantics<parallel>], iteration_bounds = array<i64: 2, 1>, scalar_prefetch = 0 : i64, scratch_operands = 0 : i64, tpu.core_type = #tpu.core_type<tc>, window_params = [{pipeline_mode = #tpu.pipeline_mode<synchronous>, transform_indices = @transform_0, window_bounds = array<i64: 8, 112>}, {transform_indices = @transform_1, window_bounds = array<i64: 1, 112, 4096>}, {pipeline_mode = #tpu.pipeline_mode<synchronous>, transform_indices = @transform_2, window_bounds = array<i64: 8, 1>}, {transform_indices = @transform_3, window_bounds = array<i64: 1, 8, 4096>}]} {
    %c0 = arith.constant 0 : index
    %c0_0 = arith.constant 0 : index
    %0 = vector.load %arg2[%c0, %c0_0] : memref<8x112xf32, #tpu.memory_space<vmem>>, vector<8x112xf32>
    %c0_1 = arith.constant 0 : index
    %c0_2 = arith.constant 0 : index
    %c0_3 = arith.constant 0 : index
    %1 = vector.load %arg3[%c0_1, %c0_2, %c0_3] : memref<1x112x4096xf32, #tpu.memory_space<vmem>>, vector<1x112x4096xf32>
    %2 = vector.shape_cast %1 : vector<1x112x4096xf32> to vector<112x4096xf32>
    %cst = arith.constant dense<0.000000e+00> : vector<8x4096xf32>
    %3 = tpu.matmul %0, %2, %cst {dimension_numbers = #tpu.dot_dimension_numbers<[1], [0], [0], [1], [0, 0, 1, 1], [], []>} : vector<8x112xf32>, vector<112x4096xf32>, vector<8x4096xf32> -> vector<8x4096xf32>
    %c0_4 = arith.constant 0 : index
    %c0_5 = arith.constant 0 : index
    %4 = vector.load %arg4[%c0_4, %c0_5] : memref<8x1xf32, #tpu.memory_space<vmem>>, vector<8x1xf32>
    %5 = vector.broadcast %4 : vector<8x1xf32> to vector<8x4096xf32>
    %6 = arith.addf %3, %5 : vector<8x4096xf32>
    %cst_6 = arith.constant 0.000000e+00 : f32
    %7 = vector.broadcast %cst_6 : f32 to vector<8x4096xf32>
    %8 = arith.maximumf %6, %7 : vector<8x4096xf32>
    %c0_7 = arith.constant 0 : index
    %c0_8 = arith.constant 0 : index
    %c0_9 = arith.constant 0 : index
    %9 = vector.load %arg5[%c0_7, %c0_8, %c0_9] : memref<1x8x4096xf32, #tpu.memory_space<vmem>>, vector<1x8x4096xf32>
    %10 = vector.shape_cast %9 : vector<1x8x4096xf32> to vector<8x4096xf32>
    %11 = vector.shape_cast %8 : vector<8x4096xf32> to vector<1x8x4096xf32>
    tpu.vector_store %arg5[%c0_7, %c0_8, %c0_9], %11 {strides = array<i32>} : memref<1x8x4096xf32, #tpu.memory_space<vmem>>, vector<1x8x4096xf32>,
    return
  }
  func.func @transform_0(%arg0: i32, %arg1: i32) -> (i32, i32) {
    %c0_i32 = arith.constant 0 : i32
    %c0_i32_0 = arith.constant 0 : i32
    %c0_i32_1 = arith.constant 0 : i32
    return %c0_i32, %c0_i32_0 : i32, i32
  }
  func.func @transform_1(%arg0: i32, %arg1: i32) -> (i32, i32, i32) {
    %c0_i32 = arith.constant 0 : i32
    %c0_i32_0 = arith.constant 0 : i32
    return %arg0, %c0_i32, %arg1 : i32, i32, i32
  }
  func.func @transform_2(%arg0: i32, %arg1: i32) -> (i32, i32) {
    %c0_i32 = arith.constant 0 : i32
    %c0_i32_0 = arith.constant 0 : i32
    %c0_i32_1 = arith.constant 0 : i32
    return %c0_i32, %c0_i32_0 : i32, i32
  }
  func.func @transform_3(%arg0: i32, %arg1: i32) -> (i32, i32, i32) {
    %c0_i32 = arith.constant 0 : i32
    %c0_i32_0 = arith.constant 0 : i32
    return %arg0, %c0_i32, %arg1 : i32, i32, i32
  }
}

</mosaic_0001>

<bundles_post_ra>
// kernel: conv3d_bn_relu.1
= control target key start
LH: loop header
LB: loop body
LE: loop exit
PB: predicated region body
PF: predicated region fallthrough
CT: control target
= control target key end

     0   :  { %s2506_s12 = smov 0   ;;  %s2508_s13 = smov 0   ;;  %s3122_s0 = inlined_call_operand.vmem [shape: f32[8,112], index: 0, kind: input, shape index: {}]   ;;  %s3123_s1 = inlined_call_operand.vmem [shape: f32[2,112,4096], index: 1, kind: input, shape index: {}]   ;;  %s3124_s2 = inlined_call_operand.vmem [shape: f32[8,1], index: 2, kind: input, shape index: {}]   ;;  %s3125_s3 = inlined_call_operand.vmem [shape: f32[2,8,4096], index: 3, kind: output, shape index: {}]  }
   0x1   :  { %s2510_s14 = smov 0  }
   0x2 LB: > { %s25_s15 = sadd.s32 1, %s2478_s13  ;;  %p1960_p0 = scmp.ge.s32.totalorder %s2482_s14, 1  ;;  %s2482_s14 = sphi %s2510_s14, %s13_s14   ;;  %s2478_s13 = sphi %s2508_s13, %s3127_s13   ;;  %s2474_s12 = sphi %s2506_s12, %s3126_s12  }
   0x3   : > { %p27_p1 = scmp.ge.s32.totalorder %s25_s15, 2  ;;  %p158_p2 = scmp.lt.s32.totalorder %s2482_s14, 3 }
   0x5   : > { %s3129_s15 = smov (%p27_p1, %s25_s15), 0  ;;  %p159_p3 = pnand %p1960_p0, %p158_p2 }
   0x6   : > { %p191_p4 = scmp.lt.s32.totalorder (!%p159_p3), %s2474_s12, 1  ;;  %v659_v0 = vld [vmem:[%s3124_s2] sm:$0xff] (!%p159_p3)  ;;  %v2484_v1 = vmov (!%p159_p3), 0.0   ;;  %v2485_v2 = vmov (!%p159_p3), 0   ;;  %vm665_vm0 = vcmask (!%p159_p3), 916480  }
   0x7   : > { %162 = sbr.rel (%p159_p3) target bundleno = 465 (0x1d1), region = 32  ;;  %733 = vmatprep.mubr.f32.mxu0 (!%p159_p3), %v2484_v1  ;;  %804 = vmatprep.mubr.f32.mxu1 (!%p159_p3), %v2484_v1 }
   0x8   : > { %2458 = vset.pattern.permute.xlu0 (!%p159_p3), %v2485_v2 }
   0x9   : > { %662 = vperm.xlu0 (!%p159_p3), %2458, %v659_v0  }
   0xe   : > { %s3131_s12 = smov (!%p191_p4, %s2474_s12), 1 }
   0xf   : > { %s2431_s18 = smul.u32 3584, %s3131_s12  ;;  %s1982_s26 = sshll.u32 %s3131_s12, 8 }
  0x10   : > { %s3048_s29 = scalar_lea.vmem %s3125_s3, %s1982_s26 }
  0x11   : > { %s2535_s21 = scalar_lea.vmem %s3123_s1, %s2431_s18 }
  0x12   : > { %v212_v3 = vld [vmem:[%s2535_s21 + $0x8] sm:$0xff]  ;;  %v214_v5 = vld [vmem:[%s2535_s21 + $0x18] sm:$0xff]  ;;  %v211_v8 = vld [vmem:[%s2535_s21] sm:$0xff] }
  0x13   : > { %v244_v4 = vld [vmem:[%s2535_s21 + $0x108] sm:$0xff]  ;;  %v246_v7 = vld [vmem:[%s2535_s21 + $0x118] sm:$0xff]  ;;  %v243_v9 = vld [vmem:[%s2535_s21 + $0x100] sm:$0xff] }
  0x14   : > { %v1983_v6 = vpack.c.bf16 %v244_v4, %v212_v3  ;;  %v2011_v10 = vpack.c.bf16 %v246_v7, %v214_v5  ;;  %v1985_v11 = vpack.c.bf16 %v243_v9, %v211_v8  ;;  %v213_v12 = vld [vmem:[%s2535_s21 + $0x10] sm:$0xff]  ;;  %v276_v14 = vld [vmem:[%s2535_s21 + $0x208] sm:$0xff]  ;;  %v278_v17 = vld [vmem:[%s2535_s21 + $0x218] sm:$0xff] }
  0x15   : > { %v245_v13 = vld [vmem:[%s2535_s21 + $0x110] sm:$0xff]  ;;  %v308_v16 = vld [vmem:[%s2535_s21 + $0x308] sm:$0xff]  ;;  %v310_v18 = vld [vmem:[%s2535_s21 + $0x318] sm:$0xff] }
  0x16   : > { %1984 = vmatprep.subr.bf16.mxu0 %v1983_v6  ;;  %v2013_v15 = vpack.c.bf16 %v245_v13, %v213_v12  ;;  %2012 = vmatprep.subr.bf16.mxu1 %v2011_v10  ;;  %v1987_v19 = vpack.c.bf16 %v308_v16, %v276_v14  ;;  %v2015_v20 = vpack.c.bf16 %v310_v18, %v278_v17  ;;  %v275_v21 = vld [vmem:[%s2535_s21 + $0x200] sm:$0xff]  ;;  %v277_v23 = vld [vmem:[%s2535_s21 + $0x210] sm:$0xff]  ;;  %v340_v26 = vld [vmem:[%s2535_s21 + $0x408] sm:$0xff] }
  0x17   : > { %1986 = vmatpush1.bf16.msra.mxu0 %v1985_v11  ;;  %v307_v22 = vld [vmem:[%s2535_s21 + $0x300] sm:$0xff]  ;;  %v309_v25 = vld [vmem:[%s2535_s21 + $0x310] sm:$0xff]  ;;  %v372_v27 = vld [vmem:[%s2535_s21 + $0x508] sm:$0xff] }
  0x18   : > { %2014 = vmatpush1.bf16.msra.mxu1 %v2013_v15  ;;  %v1989_v24 = vpack.c.bf16 %v307_v22, %v275_v21  ;;  %1988 = vmatprep.subr.bf16.mxu0 %v1987_v19  ;;  %v2017_v28 = vpack.c.bf16 %v309_v25, %v277_v23  ;;  %v1991_v29 = vpack.c.bf16 %v372_v27, %v340_v26  ;;  %v342_v30 = vld [vmem:[%s2535_s21 + $0x418] sm:$0xff]  ;;  %v339_v32 = vld [vmem:[%s2535_s21 + $0x400] sm:$0xff]  ;;  %v341_v35 = vld [vmem:[%s2535_s21 + $0x410] sm:$0xff] }
  0x19   : > { %2016 = vmatprep.subr.bf16.mxu1 %v2015_v20  ;;  %v374_v31 = vld [vmem:[%s2535_s21 + $0x518] sm:$0xff]  ;;  %v371_v34 = vld [vmem:[%s2535_s21 + $0x500] sm:$0xff]  ;;  %v373_v36 = vld [vmem:[%s2535_s21 + $0x510] sm:$0xff] }
  0x1a   : > { %v2019_v33 = vpack.c.bf16 %v374_v31, %v342_v30  ;;  %v1993_v37 = vpack.c.bf16 %v371_v34, %v339_v32  ;;  %v404_v38 = vld [vmem:[%s2535_s21 + $0x608] sm:$0xff]  ;;  %v406_v40 = vld [vmem:[%s2535_s21 + $0x618] sm:$0xff]  ;;  %v2021_v41 = vpack.c.bf16 %v373_v36, %v341_v35  ;;  %v403_v44 = vld [vmem:[%s2535_s21 + $0x600] sm:$0xff] }
  0x1b   : > { %1990 = vmatpush1.bf16.msra.mxu0 %v1989_v24  ;;  %v436_v39 = vld [vmem:[%s2535_s21 + $0x708] sm:$0xff]  ;;  %v438_v43 = vld [vmem:[%s2535_s21 + $0x718] sm:$0xff]  ;;  %v435_v45 = vld [vmem:[%s2535_s21 + $0x700] sm:$0xff] }
  0x1c   : > { %2018 = vmatpush1.bf16.msra.mxu1 %v2017_v28  ;;  %1992 = vmatprep.subr.bf16.mxu0 %v1991_v29  ;;  %v1995_v42 = vpack.c.bf16 %v436_v39, %v404_v38  ;;  %v2023_v46 = vpack.c.bf16 %v438_v43, %v406_v40  ;;  %v405_v47 = vld [vmem:[%s2535_s21 + $0x610] sm:$0xff]  ;;  %v468_v49 = vld [vmem:[%s2535_s21 + $0x808] sm:$0xff]  ;;  %v470_v51 = vld [vmem:[%s2535_s21 + $0x818] sm:$0xff]  ;;  %v1997_v53 = vpack.c.bf16 %v435_v45, %v403_v44 }
  0x1d   : > { %2020 = vmatprep.subr.bf16.mxu1 %v2019_v33  ;;  %v437_v48 = vld [vmem:[%s2535_s21 + $0x710] sm:$0xff]  ;;  %v500_v50 = vld [vmem:[%s2535_s21 + $0x908] sm:$0xff]  ;;  %v502_v52 = vld [vmem:[%s2535_s21 + $0x918] sm:$0xff] }
  0x1e   : > { %v2025_v54 = vpack.c.bf16 %v437_v48, %v405_v47  ;;  %v1999_v55 = vpack.c.bf16 %v500_v50, %v468_v49  ;;  %v467_v56 = vld [vmem:[%s2535_s21 + $0x800] sm:$0xff]  ;;  %v469_v58 = vld [vmem:[%s2535_s21 + $0x810] sm:$0xff]  ;;  %v2027_v59 = vpack.c.bf16 %v502_v52, %v470_v51  ;;  %v532_v61 = vld [vmem:[%s2535_s21 + $0xa08] sm:$0xff] }
  0x1f   : > { %1994 = vmatpush1.bf16.msra.mxu0 %v1993_v37  ;;  %v499_v57 = vld [vmem:[%s2535_s21 + $0x900] sm:$0xff]  ;;  %v501_v60 = vld [vmem:[%s2535_s21 + $0x910] sm:$0xff]  ;;  %v564_v62 = vld [vmem:[%s2535_s21 + $0xb08] sm:$0xff] }
  0x20   : > { %2022 = vmatpush1.bf16.msra.mxu1 %v2021_v41  ;;  %1996 = vmatprep.subr.bf16.mxu0 %v1995_v42  ;;  %v534_v63 = vld [vmem:[%s2535_s21 + $0xa18] sm:$0xff]  ;;  %v2001_v2 = vpack.c.bf16 %v499_v57, %v467_v56  ;;  %v2029_v3 = vpack.c.bf16 %v501_v60, %v469_v58  ;;  %v2003_v4 = vpack.c.bf16 %v564_v62, %v532_v61  ;;  %v531_v5 = vld [vmem:[%s2535_s21 + $0xa00] sm:$0xff]  ;;  %v533_v7 = vld [vmem:[%s2535_s21 + $0xa10] sm:$0xff] }
  0x21   : > { %2024 = vmatprep.subr.bf16.mxu1 %v2023_v46  ;;  %v566_v0 = vld [vmem:[%s2535_s21 + $0xb18] sm:$0xff]  ;;  %v563_v6 = vld [vmem:[%s2535_s21 + $0xb00] sm:$0xff]  ;;  %v565_v9 = vld [vmem:[%s2535_s21 + $0xb10] sm:$0xff] }
  0x22   : > { %v2031_v8 = vpack.c.bf16 %v566_v0, %v534_v63  ;;  %v596_v10 = vld [vmem:[%s2535_s21 + $0xc08] sm:$0xff]  ;;  %v598_v12 = vld [vmem:[%s2535_s21 + $0xc18] sm:$0xff]  ;;  %v2005_v14 = vpack.c.bf16 %v563_v6, %v531_v5  ;;  %v2033_v15 = vpack.c.bf16 %v565_v9, %v533_v7  ;;  %v595_v17 = vld [vmem:[%s2535_s21 + $0xc00] sm:$0xff] }
  0x23   : > { %1998 = vmatpush1.bf16.msra.mxu0 %v1997_v53  ;;  %v628_v11 = vld [vmem:[%s2535_s21 + $0xd08] sm:$0xff]  ;;  %v630_v13 = vld [vmem:[%s2535_s21 + $0xd18] sm:$0xff]  ;;  %v627_v18 = vld [vmem:[%s2535_s21 + $0xd00] sm:$0xff] }
  0x24   : > { %2026 = vmatpush1.bf16.msra.mxu1 %v2025_v54  ;;  %2000 = vmatprep.subr.bf16.mxu0 %v1999_v55  ;;  %v2007_v16 = vpack.c.bf16 %v628_v11, %v596_v10  ;;  %v597_v19 = vld [vmem:[%s2535_s21 + $0xc10] sm:$0xff]  ;;  %v2035_v20 = vpack.c.bf16 %v630_v13, %v598_v12  ;;  %v216_v22 = vld [vmem:[%s2535_s21 + $0x28] sm:$0xff]  ;;  %v218_v24 = vld [vmem:[%s2535_s21 + $0x38] sm:$0xff]  ;;  %v2009_v26 = vpack.c.bf16 %v627_v18, %v595_v17 }
  0x25   : > { %2028 = vmatprep.subr.bf16.mxu1 %v2027_v59  ;;  %v629_v21 = vld [vmem:[%s2535_s21 + $0xd10] sm:$0xff]  ;;  %v248_v23 = vld [vmem:[%s2535_s21 + $0x128] sm:$0xff]  ;;  %v250_v25 = vld [vmem:[%s2535_s21 + $0x138] sm:$0xff] }
  0x26   : > { %v2037_v27 = vpack.c.bf16 %v629_v21, %v597_v19  ;;  %v2039_v28 = vpack.c.bf16 %v248_v23, %v216_v22  ;;  %v215_v29 = vld [vmem:[%s2535_s21 + $0x20] sm:$0xff]  ;;  %v217_v31 = vld [vmem:[%s2535_s21 + $0x30] sm:$0xff]  ;;  %v2067_v32 = vpack.c.bf16 %v250_v25, %v218_v24  ;;  %v280_v34 = vld [vmem:[%s2535_s21 + $0x228] sm:$0xff] }
  0x27   : > { %2002 = vmatpush1.bf16.msra.mxu0 %v2001_v2  ;;  %v247_v30 = vld [vmem:[%s2535_s21 + $0x120] sm:$0xff]  ;;  %v249_v33 = vld [vmem:[%s2535_s21 + $0x130] sm:$0xff]  ;;  %v312_v35 = vld [vmem:[%s2535_s21 + $0x328] sm:$0xff] }
  0x28   : > { %2030 = vmatpush1.bf16.msra.mxu1 %v2029_v3  ;;  %2004 = vmatprep.subr.bf16.mxu0 %v2003_v4  ;;  %v282_v36 = vld [vmem:[%s2535_s21 + $0x238] sm:$0xff]  ;;  %v2608_v38 = vld [vmem:[%s3122_s0] sm:$0xff]  ;;  %v2041_v39 = vpack.c.bf16 %v247_v30, %v215_v29  ;;  %v2069_v40 = vpack.c.bf16 %v249_v33, %v217_v31  ;;  %v2043_v41 = vpack.c.bf16 %v312_v35, %v280_v34  ;;  %v281_v44 = vld [vmem:[%s2535_s21 + $0x230] sm:$0xff] }
  0x29   : > { %2032 = vmatprep.subr.bf16.mxu1 %v2031_v8  ;;  %v314_v37 = vld [vmem:[%s2535_s21 + $0x338] sm:$0xff]  ;;  %v279_v42 = vld [vmem:[%s2535_s21 + $0x220] sm:$0xff]  ;;  %v313_v46 = vld [vmem:[%s2535_s21 + $0x330] sm:$0xff] }
  0x2a   : > { %v311_v43 = vld [vmem:[%s2535_s21 + $0x320] sm:$0xff]  ;;  %v2071_v45 = vpack.c.bf16 %v314_v37, %v282_v36  ;;  %v344_v47 = vld [vmem:[%s2535_s21 + $0x428] sm:$0xff]  ;;  %v346_v49 = vld [vmem:[%s2535_s21 + $0x438] sm:$0xff]  ;;  %v2073_v52 = vpack.c.bf16 %v313_v46, %v281_v44 }
  0x2b   : > { %2006 = vmatpush1.bf16.msra.mxu0 %v2005_v14  ;;  %v376_v48 = vld [vmem:[%s2535_s21 + $0x528] sm:$0xff]  ;;  %v378_v50 = vld [vmem:[%s2535_s21 + $0x538] sm:$0xff]  ;;  %v2045_v51 = vpack.c.bf16 %v311_v43, %v279_v42  ;;  %v343_v54 = vld [vmem:[%s2535_s21 + $0x420] sm:$0xff] }
  0x2c   : > { %2034 = vmatpush1.bf16.msra.mxu1 %v2033_v15  ;;  %2008 = vmatprep.subr.bf16.mxu0 %v2007_v16  ;;  %v2047_v53 = vpack.c.bf16 %v376_v48, %v344_v47  ;;  %v375_v55 = vld [vmem:[%s2535_s21 + $0x520] sm:$0xff]  ;;  %v345_v56 = vld [vmem:[%s2535_s21 + $0x430] sm:$0xff]  ;;  %v2075_v57 = vpack.c.bf16 %v378_v50, %v346_v49  ;;  %v408_v59 = vld [vmem:[%s2535_s21 + $0x628] sm:$0xff] }
  0x2d   : > { %2036 = vmatprep.subr.bf16.mxu1 %v2035_v20  ;;  %v377_v58 = vld [vmem:[%s2535_s21 + $0x530] sm:$0xff]  ;;  %v440_v60 = vld [vmem:[%s2535_s21 + $0x728] sm:$0xff]  ;;  %v410_v61 = vld [vmem:[%s2535_s21 + $0x638] sm:$0xff]  ;;  %v2049_v63 = vpack.c.bf16 %v375_v55, %v343_v54 }
  0x2e   : > { %v442_v62 = vld [vmem:[%s2535_s21 + $0x738] sm:$0xff]  ;;  %v2077_v0 = vpack.c.bf16 %v377_v58, %v345_v56  ;;  %v2051_v2 = vpack.c.bf16 %v440_v60, %v408_v59  ;;  %v407_v3 = vld [vmem:[%s2535_s21 + $0x620] sm:$0xff]  ;;  %v409_v5 = vld [vmem:[%s2535_s21 + $0x630] sm:$0xff] }
  0x2f   : > { %2010 = vmatpush1.bf16.msra.mxu0 %v2009_v26  ;;  %v439_v4 = vld [vmem:[%s2535_s21 + $0x720] sm:$0xff]  ;;  %v2079_v6 = vpack.c.bf16 %v442_v62, %v410_v61  ;;  %v441_v7 = vld [vmem:[%s2535_s21 + $0x730] sm:$0xff]  ;;  %v472_v8 = vld [vmem:[%s2535_s21 + $0x828] sm:$0xff] }
  0x30   : > { %2038 = vmatpush1.bf16.msra.mxu1 %v2037_v27  ;;  %2040 = vmatprep.subr.bf16.mxu0 %v2039_v28  ;;  %v504_v9 = vld [vmem:[%s2535_s21 + $0x928] sm:$0xff]  ;;  %v474_v10 = vld [vmem:[%s2535_s21 + $0x838] sm:$0xff]  ;;  %v2053_v12 = vpack.c.bf16 %v439_v4, %v407_v3  ;;  %v2081_v13 = vpack.c.bf16 %v441_v7, %v409_v5  ;;  %v471_v15 = vld [vmem:[%s2535_s21 + $0x820] sm:$0xff] }
  0x31   : > { %2068 = vmatprep.subr.bf16.mxu1 %v2067_v32  ;;  %v506_v11 = vld [vmem:[%s2535_s21 + $0x938] sm:$0xff]  ;;  %v2055_v14 = vpack.c.bf16 %v504_v9, %v472_v8  ;;  %v503_v16 = vld [vmem:[%s2535_s21 + $0x920] sm:$0xff]  ;;  %v473_v17 = vld [vmem:[%s2535_s21 + $0x830] sm:$0xff] }
  0x32   : > { %1964 = vmatmul.mubr.msk.f32.vlgmr.msra.gmra.mrb[0].mxu0 %vm665_vm0, %v2608_v38  ;;  %v2083_v18 = vpack.c.bf16 %v506_v11, %v474_v10  ;;  %v505_v19 = vld [vmem:[%s2535_s21 + $0x930] sm:$0xff]  ;;  %v536_v20 = vld [vmem:[%s2535_s21 + $0xa28] sm:$0xff]  ;;  %v538_v22 = vld [vmem:[%s2535_s21 + $0xa38] sm:$0xff]  ;;  %v2057_v24 = vpack.c.bf16 %v503_v16, %v471_v15 }
  0x33   : > { %1965 = vmatmul.mubr.msk.f32.vlgmr.msra.gmra.mrb[0].mxu1 %vm665_vm0, %v2608_v38  ;;  %2042 = vmatpush1.bf16.msra.mxu0 %v2041_v39  ;;  %v568_v21 = vld [vmem:[%s2535_s21 + $0xb28] sm:$0xff]  ;;  %v570_v23 = vld [vmem:[%s2535_s21 + $0xb38] sm:$0xff]  ;;  %v2085_v25 = vpack.c.bf16 %v505_v19, %v473_v17  ;;  %v535_v27 = vld [vmem:[%s2535_s21 + $0xa20] sm:$0xff] }
  0x34   : > { %2070 = vmatpush1.bf16.msra.mxu1 %v2069_v40  ;;  %2044 = vmatprep.subr.bf16.mxu0 %v2043_v41  ;;  %v2059_v26 = vpack.c.bf16 %v568_v21, %v536_v20  ;;  %v567_v28 = vld [vmem:[%s2535_s21 + $0xb20] sm:$0xff]  ;;  %v537_v29 = vld [vmem:[%s2535_s21 + $0xa30] sm:$0xff]  ;;  %v2087_v30 = vpack.c.bf16 %v570_v23, %v538_v22  ;;  %v600_v32 = vld [vmem:[%s2535_s21 + $0xc28] sm:$0xff] }
  0x35   : > { %2072 = vmatprep.subr.bf16.mxu1 %v2071_v45  ;;  %875 = vmatprep.mubr.f32.mxu0 %v2484_v1  ;;  %v569_v31 = vld [vmem:[%s2535_s21 + $0xb30] sm:$0xff]  ;;  %v632_v33 = vld [vmem:[%s2535_s21 + $0xd28] sm:$0xff]  ;;  %v602_v34 = vld [vmem:[%s2535_s21 + $0xc38] sm:$0xff]  ;;  %v2061_v36 = vpack.c.bf16 %v567_v28, %v535_v27 }
  0x36   : > { %946 = vmatprep.mubr.f32.mxu1 %v2484_v1  ;;  %v634_v35 = vld [vmem:[%s2535_s21 + $0xd38] sm:$0xff]  ;;  %v2089_v37 = vpack.c.bf16 %v569_v31, %v537_v29  ;;  %v2063_v39 = vpack.c.bf16 %v632_v33, %v600_v32  ;;  %v599_v40 = vld [vmem:[%s2535_s21 + $0xc20] sm:$0xff]  ;;  %v601_v42 = vld [vmem:[%s2535_s21 + $0xc30] sm:$0xff] }
  0x37   : > { %2046 = vmatpush1.bf16.msra.mxu0 %v2045_v51  ;;  %v631_v41 = vld [vmem:[%s2535_s21 + $0xd20] sm:$0xff]  ;;  %v2091_v43 = vpack.c.bf16 %v634_v35, %v602_v34  ;;  %v633_v44 = vld [vmem:[%s2535_s21 + $0xd30] sm:$0xff]  ;;  %v220_v45 = vld [vmem:[%s2535_s21 + $0x48] sm:$0xff] }
  0x38   : > { %2074 = vmatpush1.bf16.msra.mxu1 %v2073_v52  ;;  %2048 = vmatprep.subr.bf16.mxu0 %v2047_v53  ;;  %v252_v46 = vld [vmem:[%s2535_s21 + $0x148] sm:$0xff]  ;;  %v222_v47 = vld [vmem:[%s2535_s21 + $0x58] sm:$0xff]  ;;  %v2065_v49 = vpack.c.bf16 %v631_v41, %v599_v40  ;;  %v2093_v50 = vpack.c.bf16 %v633_v44, %v601_v42  ;;  %v219_v52 = vld [vmem:[%s2535_s21 + $0x40] sm:$0xff] }
  0x39   : > { %2076 = vmatprep.subr.bf16.mxu1 %v2075_v57  ;;  %v254_v48 = vld [vmem:[%s2535_s21 + $0x158] sm:$0xff]  ;;  %v2095_v51 = vpack.c.bf16 %v252_v46, %v220_v45  ;;  %v251_v53 = vld [vmem:[%s2535_s21 + $0x140] sm:$0xff]  ;;  %v221_v54 = vld [vmem:[%s2535_s21 + $0x50] sm:$0xff] }
  0x3a   : > { %v2123_v55 = vpack.c.bf16 %v254_v48, %v222_v47  ;;  %v253_v56 = vld [vmem:[%s2535_s21 + $0x150] sm:$0xff]  ;;  %v284_v57 = vld [vmem:[%s2535_s21 + $0x248] sm:$0xff]  ;;  %v286_v59 = vld [vmem:[%s2535_s21 + $0x258] sm:$0xff]  ;;  %v2097_v61 = vpack.c.bf16 %v251_v53, %v219_v52 }
  0x3b   : > { %2050 = vmatpush1.bf16.msra.mxu0 %v2049_v63  ;;  %v316_v58 = vld [vmem:[%s2535_s21 + $0x348] sm:$0xff]  ;;  %v318_v60 = vld [vmem:[%s2535_s21 + $0x358] sm:$0xff]  ;;  %v2125_v62 = vpack.c.bf16 %v253_v56, %v221_v54  ;;  %v285_v3 = vld [vmem:[%s2535_s21 + $0x250] sm:$0xff] }
  0x3c   : > { %2078 = vmatpush1.bf16.msra.mxu1 %v2077_v0  ;;  %2052 = vmatprep.subr.bf16.mxu0 %v2051_v2  ;;  %v2099_v63 = vpack.c.bf16 %v316_v58, %v284_v57  ;;  %v283_v0 = vld [vmem:[%s2535_s21 + $0x240] sm:$0xff]  ;;  %v2127_v4 = vpack.c.bf16 %v318_v60, %v286_v59  ;;  %v317_v5 = vld [vmem:[%s2535_s21 + $0x350] sm:$0xff]  ;;  %v380_v7 = vld [vmem:[%s2535_s21 + $0x548] sm:$0xff] }
  0x3d   : > { %2080 = vmatprep.subr.bf16.mxu1 %v2079_v6  ;;  %v315_v2 = vld [vmem:[%s2535_s21 + $0x340] sm:$0xff]  ;;  %v348_v6 = vld [vmem:[%s2535_s21 + $0x448] sm:$0xff]  ;;  %v350_v8 = vld [vmem:[%s2535_s21 + $0x458] sm:$0xff]  ;;  %v2129_v11 = vpack.c.bf16 %v317_v5, %v285_v3 }
  0x3e   : > { %v382_v9 = vld [vmem:[%s2535_s21 + $0x558] sm:$0xff]  ;;  %v2101_v10 = vpack.c.bf16 %v315_v2, %v283_v0  ;;  %v349_v15 = vld [vmem:[%s2535_s21 + $0x450] sm:$0xff]  ;;  %v444_v19 = vld [vmem:[%s2535_s21 + $0x748] sm:$0xff] }
  0x3f   : > { %2054 = vmatpush1.bf16.msra.mxu0 %v2053_v12  ;;  %v2103_v12 = vpack.c.bf16 %v380_v7, %v348_v6  ;;  %v2131_v16 = vpack.c.bf16 %v382_v9, %v350_v8  ;;  %v381_v17 = vld [vmem:[%s2535_s21 + $0x550] sm:$0xff]  ;;  %v414_v20 = vld [vmem:[%s2535_s21 + $0x658] sm:$0xff]  ;;  %v508_v31 = vld [vmem:[%s2535_s21 + $0x948] sm:$0xff] }
  0x40   : > { %2082 = vmatpush1.bf16.msra.mxu1 %v2081_v13  ;;  %2056 = vmatprep.subr.bf16.mxu0 %v2055_v14  ;;  %v347_v13 = vld [vmem:[%s2535_s21 + $0x440] sm:$0xff]  ;;  %v446_v21 = vld [vmem:[%s2535_s21 + $0x758] sm:$0xff]  ;;  %v2133_v23 = vpack.c.bf16 %v381_v17, %v349_v15  ;;  %v413_v27 = vld [vmem:[%s2535_s21 + $0x650] sm:$0xff] }
  0x41   : > { %2084 = vmatprep.subr.bf16.mxu1 %v2083_v18  ;;  %v379_v14 = vld [vmem:[%s2535_s21 + $0x540] sm:$0xff]  ;;  %v412_v18 = vld [vmem:[%s2535_s21 + $0x648] sm:$0xff]  ;;  %v2135_v28 = vpack.c.bf16 %v446_v21, %v414_v20  ;;  %v445_v29 = vld [vmem:[%s2535_s21 + $0x750] sm:$0xff] }
  0x42   : > { %v2105_v22 = vpack.c.bf16 %v379_v14, %v347_v13  ;;  %v478_v32 = vld [vmem:[%s2535_s21 + $0x858] sm:$0xff]  ;;  %v2137_v35 = vpack.c.bf16 %v445_v29, %v413_v27  ;;  %v477_v40 = vld [vmem:[%s2535_s21 + $0x850] sm:$0xff]  ;;  %v572_v44 = vld [vmem:[%s2535_s21 + $0xb48] sm:$0xff] }
  0x43   : > { %2058 = vmatpush1.bf16.msra.mxu0 %v2057_v24  ;;  %v2107_v24 = vpack.c.bf16 %v444_v19, %v412_v18  ;;  %v510_v33 = vld [vmem:[%s2535_s21 + $0x958] sm:$0xff]  ;;  %v509_v42 = vld [vmem:[%s2535_s21 + $0x950] sm:$0xff]  ;;  %v636_v56 = vld [vmem:[%s2535_s21 + $0xd48] sm:$0xff] }
  0x44   : > { %2086 = vmatpush1.bf16.msra.mxu1 %v2085_v25  ;;  %2060 = vmatprep.subr.bf16.mxu0 %v2059_v26  ;;  %v411_v25 = vld [vmem:[%s2535_s21 + $0x640] sm:$0xff]  ;;  %v2139_v41 = vpack.c.bf16 %v510_v33, %v478_v32  ;;  %v542_v45 = vld [vmem:[%s2535_s21 + $0xa58] sm:$0xff]  ;;  %v2141_v48 = vpack.c.bf16 %v509_v42, %v477_v40  ;;  %v541_v52 = vld [vmem:[%s2535_s21 + $0xa50] sm:$0xff] }
  0x45   : > { %2088 = vmatprep.subr.bf16.mxu1 %v2087_v30  ;;  %v443_v26 = vld [vmem:[%s2535_s21 + $0x740] sm:$0xff]  ;;  %v476_v30 = vld [vmem:[%s2535_s21 + $0x848] sm:$0xff]  ;;  %v574_v46 = vld [vmem:[%s2535_s21 + $0xb58] sm:$0xff] }
  0x46   : > { %v2109_v34 = vpack.c.bf16 %v443_v26, %v411_v25  ;;  %v2143_v53 = vpack.c.bf16 %v574_v46, %v542_v45  ;;  %v573_v54 = vld [vmem:[%s2535_s21 + $0xb50] sm:$0xff]  ;;  %v606_v57 = vld [vmem:[%s2535_s21 + $0xc58] sm:$0xff]  ;;  %v256_v5 = vld [vmem:[%s2535_s21 + $0x168] sm:$0xff] }
  0x47   : > { %2062 = vmatpush1.bf16.msra.mxu0 %v2061_v36  ;;  %v2111_v36 = vpack.c.bf16 %v508_v31, %v476_v30  ;;  %v638_v58 = vld [vmem:[%s2535_s21 + $0xd58] sm:$0xff]  ;;  %v2145_v60 = vpack.c.bf16 %v573_v54, %v541_v52  ;;  %v605_v0 = vld [vmem:[%s2535_s21 + $0xc50] sm:$0xff]  ;;  %v320_v17 = vld [vmem:[%s2535_s21 + $0x368] sm:$0xff] }
  0x48   : > { %2090 = vmatpush1.bf16.msra.mxu1 %v2089_v37  ;;  %2064 = vmatprep.subr.bf16.mxu0 %v2063_v39  ;;  %v475_v37 = vld [vmem:[%s2535_s21 + $0x840] sm:$0xff]  ;;  %v2147_v2 = vpack.c.bf16 %v638_v58, %v606_v57  ;;  %v637_v3 = vld [vmem:[%s2535_s21 + $0xd50] sm:$0xff]  ;;  %v226_v6 = vld [vmem:[%s2535_s21 + $0x78] sm:$0xff] }
  0x49   : > { %2092 = vmatprep.subr.bf16.mxu1 %v2091_v43  ;;  %v507_v39 = vld [vmem:[%s2535_s21 + $0x940] sm:$0xff]  ;;  %v540_v43 = vld [vmem:[%s2535_s21 + $0xa48] sm:$0xff]  ;;  %v258_v7 = vld [vmem:[%s2535_s21 + $0x178] sm:$0xff]  ;;  %v2149_v9 = vpack.c.bf16 %v637_v3, %v605_v0 }
  0x4a   : > { %v2113_v47 = vpack.c.bf16 %v507_v39, %v475_v37  ;;  %v225_v13 = vld [vmem:[%s2535_s21 + $0x70] sm:$0xff]  ;;  %v2179_v14 = vpack.c.bf16 %v258_v7, %v226_v6  ;;  %v290_v18 = vld [vmem:[%s2535_s21 + $0x278] sm:$0xff]  ;;  %v384_v29 = vld [vmem:[%s2535_s21 + $0x568] sm:$0xff] }
  0x4b   : > { %2066 = vmatpush1.bf16.msra.mxu0 %v2065_v49  ;;  %v2115_v49 = vpack.c.bf16 %v572_v44, %v540_v43  ;;  %v257_v15 = vld [vmem:[%s2535_s21 + $0x170] sm:$0xff]  ;;  %v322_v19 = vld [vmem:[%s2535_s21 + $0x378] sm:$0xff]  ;;  %v448_v42 = vld [vmem:[%s2535_s21 + $0x768] sm:$0xff] }
  0x4c   : > { %2094 = vmatpush1.bf16.msra.mxu1 %v2093_v50  ;;  %2096 = vmatprep.subr.bf16.mxu0 %v2095_v51  ;;  %v539_v50 = vld [vmem:[%s2535_s21 + $0xa40] sm:$0xff]  ;;  %v2181_v21 = vpack.c.bf16 %v257_v15, %v225_v13  ;;  %v289_v25 = vld [vmem:[%s2535_s21 + $0x270] sm:$0xff]  ;;  %v2183_v26 = vpack.c.bf16 %v322_v19, %v290_v18  ;;  %v354_v30 = vld [vmem:[%s2535_s21 + $0x478] sm:$0xff] }
  0x4d   : > { %2124 = vmatprep.subr.bf16.mxu1 %v2123_v55  ;;  %v571_v51 = vld [vmem:[%s2535_s21 + $0xb40] sm:$0xff]  ;;  %v604_v55 = vld [vmem:[%s2535_s21 + $0xc48] sm:$0xff]  ;;  %v321_v27 = vld [vmem:[%s2535_s21 + $0x370] sm:$0xff] }
  0x4e   : > { %1966 = vmatmul.mubr.msk.f32.vlgmr.msra.gmra.mrb[2].mxu0 %vm665_vm0, %v2608_v38  ;;  %v2117_v59 = vpack.c.bf16 %v571_v51, %v539_v50  ;;  %v386_v31 = vld [vmem:[%s2535_s21 + $0x578] sm:$0xff]  ;;  %v2185_v33 = vpack.c.bf16 %v321_v27, %v289_v25  ;;  %v353_v37 = vld [vmem:[%s2535_s21 + $0x470] sm:$0xff]  ;;  %v512_v54 = vld [vmem:[%s2535_s21 + $0x968] sm:$0xff] }
  0x4f   : > { %1967 = vmatmul.mubr.msk.f32.vlgmr.msra.gmra.mrb[2].mxu1 %vm665_vm0, %v2608_v38  ;;  %2098 = vmatpush1.bf16.msra.mxu0 %v2097_v61  ;;  %v2119_v61 = vpack.c.bf16 %v636_v56, %v604_v55  ;;  %v2187_v39 = vpack.c.bf16 %v386_v31, %v354_v30  ;;  %v385_v40 = vld [vmem:[%s2535_s21 + $0x570] sm:$0xff]  ;;  %v418_v43 = vld [vmem:[%s2535_s21 + $0x678] sm:$0xff]  ;;  %v576_v3 = vld [vmem:[%s2535_s21 + $0xb68] sm:$0xff] }
  0x50   : > { %2126 = vmatpush1.bf16.msra.mxu1 %v2125_v62  ;;  %2100 = vmatprep.subr.bf16.mxu0 %v2099_v63  ;;  %v603_v62 = vld [vmem:[%s2535_s21 + $0xc40] sm:$0xff]  ;;  %v450_v44 = vld [vmem:[%s2535_s21 + $0x778] sm:$0xff]  ;;  %v2189_v46 = vpack.c.bf16 %v385_v40, %v353_v37  ;;  %v417_v50 = vld [vmem:[%s2535_s21 + $0x670] sm:$0xff] }
  0x51   : > { %2128 = vmatprep.subr.bf16.mxu1 %v2127_v4  ;;  %1017 = vmatprep.mubr.f32.mxu0 %v2484_v1  ;;  %v635_v63 = vld [vmem:[%s2535_s21 + $0xd40] sm:$0xff]  ;;  %v224_v4 = vld [vmem:[%s2535_s21 + $0x68] sm:$0xff]  ;;  %v2191_v51 = vpack.c.bf16 %v450_v44, %v418_v43  ;;  %v449_v52 = vld [vmem:[%s2535_s21 + $0x770] sm:$0xff] }
  0x52   : > { %1088 = vmatprep.mubr.f32.mxu1 %v2484_v1  ;;  %v2121_v8 = vpack.c.bf16 %v635_v63, %v603_v62  ;;  %v482_v55 = vld [vmem:[%s2535_s21 + $0x878] sm:$0xff]  ;;  %v2193_v58 = vpack.c.bf16 %v449_v52, %v417_v50  ;;  %v481_v62 = vld [vmem:[%s2535_s21 + $0x870] sm:$0xff]  ;;  %v640_v15 = vld [vmem:[%s2535_s21 + $0xd68] sm:$0xff] }
  0x53   : > { %2102 = vmatpush1.bf16.msra.mxu0 %v2101_v10  ;;  %v2151_v10 = vpack.c.bf16 %v256_v5, %v224_v4  ;;  %v514_v56 = vld [vmem:[%s2535_s21 + $0x978] sm:$0xff]  ;;  %v513_v0 = vld [vmem:[%s2535_s21 + $0x970] sm:$0xff]  ;;  %v260_v27 = vld [vmem:[%s2535_s21 + $0x188] sm:$0xff] }
  0x54   : > { %2130 = vmatpush1.bf16.msra.mxu1 %v2129_v11  ;;  %2104 = vmatprep.subr.bf16.mxu0 %v2103_v12  ;;  %v223_v11 = vld [vmem:[%s2535_s21 + $0x60] sm:$0xff]  ;;  %v2195_v63 = vpack.c.bf16 %v514_v56, %v482_v55  ;;  %v546_v4 = vld [vmem:[%s2535_s21 + $0xa78] sm:$0xff]  ;;  %v2197_v7 = vpack.c.bf16 %v513_v0, %v481_v62  ;;  %v577_v13 = vld [vmem:[%s2535_s21 + $0xb70] sm:$0xff] }
  0x55   : > { %2132 = vmatprep.subr.bf16.mxu1 %v2131_v16  ;;  %v255_v12 = vld [vmem:[%s2535_s21 + $0x160] sm:$0xff]  ;;  %v288_v16 = vld [vmem:[%s2535_s21 + $0x268] sm:$0xff]  ;;  %v578_v5 = vld [vmem:[%s2535_s21 + $0xb78] sm:$0xff] }
  0x56   : > { %v2153_v20 = vpack.c.bf16 %v255_v12, %v223_v11  ;;  %v545_v11 = vld [vmem:[%s2535_s21 + $0xa70] sm:$0xff]  ;;  %v2199_v12 = vpack.c.bf16 %v578_v5, %v546_v4  ;;  %v324_v40 = vld [vmem:[%s2535_s21 + $0x388] sm:$0xff] }
  0x57   : > { %2106 = vmatpush1.bf16.msra.mxu0 %v2105_v22  ;;  %v2155_v22 = vpack.c.bf16 %v320_v17, %v288_v16  ;;  %v610_v16 = vld [vmem:[%s2535_s21 + $0xc78] sm:$0xff]  ;;  %v2201_v19 = vpack.c.bf16 %v577_v13, %v545_v11  ;;  %v641_v25 = vld [vmem:[%s2535_s21 + $0xd70] sm:$0xff]  ;;  %v388_v52 = vld [vmem:[%s2535_s21 + $0x588] sm:$0xff] }
  0x58   : > { %2134 = vmatpush1.bf16.msra.mxu1 %v2133_v23  ;;  %2108 = vmatprep.subr.bf16.mxu0 %v2107_v24  ;;  %v287_v23 = vld [vmem:[%s2535_s21 + $0x260] sm:$0xff]  ;;  %v642_v17 = vld [vmem:[%s2535_s21 + $0xd78] sm:$0xff]  ;;  %v261_v37 = vld [vmem:[%s2535_s21 + $0x190] sm:$0xff] }
  0x59   : > { %2136 = vmatprep.subr.bf16.mxu1 %v2135_v28  ;;  %v319_v24 = vld [vmem:[%s2535_s21 + $0x360] sm:$0xff]  ;;  %v352_v28 = vld [vmem:[%s2535_s21 + $0x468] sm:$0xff]  ;;  %v325_v50 = vld [vmem:[%s2535_s21 + $0x390] sm:$0xff] }
  0x5a   : > { %v2157_v32 = vpack.c.bf16 %v319_v24, %v287_v23  ;;  %v609_v23 = vld [vmem:[%s2535_s21 + $0xc70] sm:$0xff]  ;;  %v2203_v24 = vpack.c.bf16 %v642_v17, %v610_v16  ;;  %v452_v0 = vld [vmem:[%s2535_s21 + $0x788] sm:$0xff] }
  0x5b   : > { %2110 = vmatpush1.bf16.msra.mxu0 %v2109_v34  ;;  %v2159_v34 = vpack.c.bf16 %v384_v29, %v352_v28  ;;  %v230_v28 = vld [vmem:[%s2535_s21 + $0x98] sm:$0xff]  ;;  %v2205_v31 = vpack.c.bf16 %v641_v25, %v609_v23  ;;  %v389_v62 = vld [vmem:[%s2535_s21 + $0x590] sm:$0xff]  ;;  %v516_v13 = vld [vmem:[%s2535_s21 + $0x988] sm:$0xff] }
  0x5c   : > { %2138 = vmatpush1.bf16.msra.mxu1 %v2137_v35  ;;  %2112 = vmatprep.subr.bf16.mxu0 %v2111_v36  ;;  %v351_v35 = vld [vmem:[%s2535_s21 + $0x460] sm:$0xff]  ;;  %v262_v29 = vld [vmem:[%s2535_s21 + $0x198] sm:$0xff]  ;;  %v453_v11 = vld [vmem:[%s2535_s21 + $0x790] sm:$0xff] }
  0x5d   : > { %2140 = vmatprep.subr.bf16.mxu1 %v2139_v41  ;;  %v383_v36 = vld [vmem:[%s2535_s21 + $0x560] sm:$0xff]  ;;  %v416_v41 = vld [vmem:[%s2535_s21 + $0x668] sm:$0xff]  ;;  %v517_v23 = vld [vmem:[%s2535_s21 + $0x990] sm:$0xff] }
  0x5e   : > { %v2161_v45 = vpack.c.bf16 %v383_v36, %v351_v35  ;;  %v229_v35 = vld [vmem:[%s2535_s21 + $0x90] sm:$0xff]  ;;  %v2235_v36 = vpack.c.bf16 %v262_v29, %v230_v28  ;;  %v580_v25 = vld [vmem:[%s2535_s21 + $0xb88] sm:$0xff] }
  0x5f   : > { %2114 = vmatpush1.bf16.msra.mxu0 %v2113_v47  ;;  %v2163_v47 = vpack.c.bf16 %v448_v42, %v416_v41  ;;  %v294_v41 = vld [vmem:[%s2535_s21 + $0x298] sm:$0xff]  ;;  %v2237_v44 = vpack.c.bf16 %v261_v37, %v229_v35  ;;  %v581_v35 = vld [vmem:[%s2535_s21 + $0xb90] sm:$0xff]  ;;  %v644_v37 = vld [vmem:[%s2535_s21 + $0xd88] sm:$0xff] }
  0x60   : > { %2142 = vmatpush1.bf16.msra.mxu1 %v2141_v48  ;;  %2116 = vmatprep.subr.bf16.mxu0 %v2115_v49  ;;  %v415_v48 = vld [vmem:[%s2535_s21 + $0x660] sm:$0xff]  ;;  %v326_v42 = vld [vmem:[%s2535_s21 + $0x398] sm:$0xff] }
  0x61   : > { %2144 = vmatprep.subr.bf16.mxu1 %v2143_v53  ;;  %v447_v49 = vld [vmem:[%s2535_s21 + $0x760] sm:$0xff]  ;;  %v480_v53 = vld [vmem:[%s2535_s21 + $0x868] sm:$0xff] }
  0x62   : > { %v2165_v57 = vpack.c.bf16 %v447_v49, %v415_v48  ;;  %v293_v48 = vld [vmem:[%s2535_s21 + $0x290] sm:$0xff]  ;;  %v2239_v49 = vpack.c.bf16 %v326_v42, %v294_v41 }
  0x63   : > { %2118 = vmatpush1.bf16.msra.mxu0 %v2117_v59  ;;  %v2167_v59 = vpack.c.bf16 %v512_v54, %v480_v53  ;;  %v358_v53 = vld [vmem:[%s2535_s21 + $0x498] sm:$0xff]  ;;  %v2241_v56 = vpack.c.bf16 %v325_v50, %v293_v48  ;;  %v645_v48 = vld [vmem:[%s2535_s21 + $0xd90] sm:$0xff]  ;;  %v264_v50 = vld [vmem:[%s2535_s21 + $0x1a8] sm:$0xff] }
  0x64   : > { %2146 = vmatpush1.bf16.msra.mxu1 %v2145_v60  ;;  %2120 = vmatprep.subr.bf16.mxu0 %v2119_v61  ;;  %v479_v60 = vld [vmem:[%s2535_s21 + $0x860] sm:$0xff]  ;;  %v390_v54 = vld [vmem:[%s2535_s21 + $0x598] sm:$0xff] }
  0x65   : > { %2148 = vmatprep.subr.bf16.mxu1 %v2147_v2  ;;  %v511_v61 = vld [vmem:[%s2535_s21 + $0x960] sm:$0xff]  ;;  %v544_v2 = vld [vmem:[%s2535_s21 + $0xa68] sm:$0xff] }
  0x66   : > { %v2169_v6 = vpack.c.bf16 %v511_v61, %v479_v60  ;;  %v357_v60 = vld [vmem:[%s2535_s21 + $0x490] sm:$0xff]  ;;  %v2243_v61 = vpack.c.bf16 %v390_v54, %v358_v53 }
  0x67   : > { %2122 = vmatpush1.bf16.msra.mxu0 %v2121_v8  ;;  %v2171_v8 = vpack.c.bf16 %v576_v3, %v544_v2  ;;  %v422_v2 = vld [vmem:[%s2535_s21 + $0x698] sm:$0xff]  ;;  %v2245_v5 = vpack.c.bf16 %v389_v62, %v357_v60  ;;  %v265_v60 = vld [vmem:[%s2535_s21 + $0x1b0] sm:$0xff]  ;;  %v328_v62 = vld [vmem:[%s2535_s21 + $0x3a8] sm:$0xff] }
  0x68   : > { %2150 = vmatpush1.bf16.msra.mxu1 %v2149_v9  ;;  %2152 = vmatprep.subr.bf16.mxu0 %v2151_v10  ;;  %v543_v9 = vld [vmem:[%s2535_s21 + $0xa60] sm:$0xff]  ;;  %v454_v3 = vld [vmem:[%s2535_s21 + $0x798] sm:$0xff] }
  0x69   : > { %2180 = vmatprep.subr.bf16.mxu1 %v2179_v14  ;;  %v575_v10 = vld [vmem:[%s2535_s21 + $0xb60] sm:$0xff]  ;;  %v608_v14 = vld [vmem:[%s2535_s21 + $0xc68] sm:$0xff] }
  0x6a   : > { %1968 = vmatmul.mubr.msk.f32.vlgmr.msra.gmra.mrb[4].mxu0 %vm665_vm0, %v2608_v38  ;;  %v2173_v18 = vpack.c.bf16 %v575_v10, %v543_v9  ;;  %v421_v9 = vld [vmem:[%s2535_s21 + $0x690] sm:$0xff]  ;;  %v2247_v10 = vpack.c.bf16 %v454_v3, %v422_v2 }
  0x6b   : > { %1969 = vmatmul.mubr.msk.f32.vlgmr.msra.gmra.mrb[4].mxu1 %vm665_vm0, %v2608_v38  ;;  %2154 = vmatpush1.bf16.msra.mxu0 %v2153_v20  ;;  %v2175_v20 = vpack.c.bf16 %v640_v15, %v608_v14  ;;  %v486_v14 = vld [vmem:[%s2535_s21 + $0x898] sm:$0xff]  ;;  %v2249_v17 = vpack.c.bf16 %v453_v11, %v421_v9  ;;  %v329_v9 = vld [vmem:[%s2535_s21 + $0x3b0] sm:$0xff]  ;;  %v392_v11 = vld [vmem:[%s2535_s21 + $0x5a8] sm:$0xff] }
  0x6c   : > { %2182 = vmatpush1.bf16.msra.mxu1 %v2181_v21  ;;  %2156 = vmatprep.subr.bf16.mxu0 %v2155_v22  ;;  %v607_v21 = vld [vmem:[%s2535_s21 + $0xc60] sm:$0xff]  ;;  %v518_v15 = vld [vmem:[%s2535_s21 + $0x998] sm:$0xff] }
  0x6d   : > { %2184 = vmatprep.subr.bf16.mxu1 %v2183_v26  ;;  %1159 = vmatprep.mubr.f32.mxu0 %v2484_v1  ;;  %v639_v22 = vld [vmem:[%s2535_s21 + $0xd60] sm:$0xff]  ;;  %v228_v26 = vld [vmem:[%s2535_s21 + $0x88] sm:$0xff] }
  0x6e   : > { %1230 = vmatprep.mubr.f32.mxu1 %v2484_v1  ;;  %v2177_v30 = vpack.c.bf16 %v639_v22, %v607_v21  ;;  %v485_v21 = vld [vmem:[%s2535_s21 + $0x890] sm:$0xff]  ;;  %v2251_v22 = vpack.c.bf16 %v518_v15, %v486_v14 }
  0x6f   : > { %2158 = vmatpush1.bf16.msra.mxu0 %v2157_v32  ;;  %v2207_v32 = vpack.c.bf16 %v260_v27, %v228_v26  ;;  %v550_v26 = vld [vmem:[%s2535_s21 + $0xa98] sm:$0xff]  ;;  %v2253_v29 = vpack.c.bf16 %v517_v23, %v485_v21  ;;  %v393_v21 = vld [vmem:[%s2535_s21 + $0x5b0] sm:$0xff]  ;;  %v456_v23 = vld [vmem:[%s2535_s21 + $0x7a8] sm:$0xff] }
  0x70   : > { %2186 = vmatpush1.bf16.msra.mxu1 %v2185_v33  ;;  %2160 = vmatprep.subr.bf16.mxu0 %v2159_v34  ;;  %v227_v33 = vld [vmem:[%s2535_s21 + $0x80] sm:$0xff]  ;;  %v582_v27 = vld [vmem:[%s2535_s21 + $0xb98] sm:$0xff] }
  0x71   : > { %2188 = vmatprep.subr.bf16.mxu1 %v2187_v39  ;;  %v259_v34 = vld [vmem:[%s2535_s21 + $0x180] sm:$0xff]  ;;  %v292_v39 = vld [vmem:[%s2535_s21 + $0x288] sm:$0xff] }
  0x72   : > { %v2209_v43 = vpack.c.bf16 %v259_v34, %v227_v33  ;;  %v549_v33 = vld [vmem:[%s2535_s21 + $0xa90] sm:$0xff]  ;;  %v2255_v34 = vpack.c.bf16 %v582_v27, %v550_v26 }
  0x73   : > { %2162 = vmatpush1.bf16.msra.mxu0 %v2161_v45  ;;  %v2211_v45 = vpack.c.bf16 %v324_v40, %v292_v39  ;;  %v614_v39 = vld [vmem:[%s2535_s21 + $0xc98] sm:$0xff]  ;;  %v2257_v42 = vpack.c.bf16 %v581_v35, %v549_v33  ;;  %v488_v33 = vld [vmem:[%s2535_s21 + $0x8a8] sm:$0xff] }
  0x74   : > { %2190 = vmatpush1.bf16.msra.mxu1 %v2189_v46  ;;  %2164 = vmatprep.subr.bf16.mxu0 %v2163_v47  ;;  %v291_v46 = vld [vmem:[%s2535_s21 + $0x280] sm:$0xff]  ;;  %v646_v40 = vld [vmem:[%s2535_s21 + $0xd98] sm:$0xff] }
  0x75   : > { %2192 = vmatprep.subr.bf16.mxu1 %v2191_v51  ;;  %v323_v47 = vld [vmem:[%s2535_s21 + $0x380] sm:$0xff]  ;;  %v356_v51 = vld [vmem:[%s2535_s21 + $0x488] sm:$0xff]  ;;  %v490_v35 = vld [vmem:[%s2535_s21 + $0x8b8] sm:$0xff] }
  0x76   : > { %v2213_v55 = vpack.c.bf16 %v323_v47, %v291_v46  ;;  %v613_v46 = vld [vmem:[%s2535_s21 + $0xc90] sm:$0xff]  ;;  %v2259_v47 = vpack.c.bf16 %v646_v40, %v614_v39 }
  0x77   : > { %2166 = vmatpush1.bf16.msra.mxu0 %v2165_v57  ;;  %v2215_v57 = vpack.c.bf16 %v388_v52, %v356_v51  ;;  %v234_v51 = vld [vmem:[%s2535_s21 + $0xb8] sm:$0xff]  ;;  %v2261_v54 = vpack.c.bf16 %v645_v48, %v613_v46  ;;  %v552_v46 = vld [vmem:[%s2535_s21 + $0xaa8] sm:$0xff] }
  0x78   : > { %2194 = vmatpush1.bf16.msra.mxu1 %v2193_v58  ;;  %2168 = vmatprep.subr.bf16.mxu0 %v2167_v59  ;;  %v355_v58 = vld [vmem:[%s2535_s21 + $0x480] sm:$0xff]  ;;  %v266_v52 = vld [vmem:[%s2535_s21 + $0x1b8] sm:$0xff] }
  0x79   : > { %2196 = vmatprep.subr.bf16.mxu1 %v2195_v63  ;;  %v387_v59 = vld [vmem:[%s2535_s21 + $0x580] sm:$0xff]  ;;  %v420_v63 = vld [vmem:[%s2535_s21 + $0x688] sm:$0xff]  ;;  %v554_v48 = vld [vmem:[%s2535_s21 + $0xab8] sm:$0xff] }
  0x7a   : > { %v2217_v4 = vpack.c.bf16 %v387_v59, %v355_v58  ;;  %v233_v58 = vld [vmem:[%s2535_s21 + $0xb0] sm:$0xff]  ;;  %v2291_v59 = vpack.c.bf16 %v266_v52, %v234_v51 }
  0x7b   : > { %2170 = vmatpush1.bf16.msra.mxu0 %v2169_v6  ;;  %v2219_v6 = vpack.c.bf16 %v452_v0, %v420_v63  ;;  %v298_v63 = vld [vmem:[%s2535_s21 + $0x2b8] sm:$0xff]  ;;  %v2293_v3 = vpack.c.bf16 %v265_v60, %v233_v58  ;;  %v616_v58 = vld [vmem:[%s2535_s21 + $0xca8] sm:$0xff] }
  0x7c   : > { %2198 = vmatpush1.bf16.msra.mxu1 %v2197_v7  ;;  %2172 = vmatprep.subr.bf16.mxu0 %v2171_v8  ;;  %v419_v7 = vld [vmem:[%s2535_s21 + $0x680] sm:$0xff]  ;;  %v330_v0 = vld [vmem:[%s2535_s21 + $0x3b8] sm:$0xff] }
  0x7d   : > { %2200 = vmatprep.subr.bf16.mxu1 %v2199_v12  ;;  %v451_v8 = vld [vmem:[%s2535_s21 + $0x780] sm:$0xff]  ;;  %v484_v12 = vld [vmem:[%s2535_s21 + $0x888] sm:$0xff]  ;;  %v618_v60 = vld [vmem:[%s2535_s21 + $0xcb8] sm:$0xff] }
  0x7e   : > { %v2221_v16 = vpack.c.bf16 %v451_v8, %v419_v7  ;;  %v297_v7 = vld [vmem:[%s2535_s21 + $0x2b0] sm:$0xff]  ;;  %v2295_v8 = vpack.c.bf16 %v330_v0, %v298_v63 }
  0x7f   : > { %2174 = vmatpush1.bf16.msra.mxu0 %v2173_v18  ;;  %v2223_v18 = vpack.c.bf16 %v516_v13, %v484_v12  ;;  %v362_v12 = vld [vmem:[%s2535_s21 + $0x4b8] sm:$0xff]  ;;  %v2297_v15 = vpack.c.bf16 %v329_v9, %v297_v7  ;;  %v236_v7 = vld [vmem:[%s2535_s21 + $0xc8] sm:$0xff] }
  0x80   : > { %2202 = vmatpush1.bf16.msra.mxu1 %v2201_v19  ;;  %2176 = vmatprep.subr.bf16.mxu0 %v2175_v20  ;;  %v483_v19 = vld [vmem:[%s2535_s21 + $0x880] sm:$0xff]  ;;  %v394_v13 = vld [vmem:[%s2535_s21 + $0x5b8] sm:$0xff] }
  0x81   : > { %2204 = vmatprep.subr.bf16.mxu1 %v2203_v24  ;;  %v515_v20 = vld [vmem:[%s2535_s21 + $0x980] sm:$0xff]  ;;  %v548_v24 = vld [vmem:[%s2535_s21 + $0xa88] sm:$0xff]  ;;  %v238_v9 = vld [vmem:[%s2535_s21 + $0xd8] sm:$0xff] }
  0x82   : > { %v2225_v28 = vpack.c.bf16 %v515_v20, %v483_v19  ;;  %v361_v19 = vld [vmem:[%s2535_s21 + $0x4b0] sm:$0xff]  ;;  %v2299_v20 = vpack.c.bf16 %v394_v13, %v362_v12 }
  0x83   : > { %2178 = vmatpush1.bf16.msra.mxu0 %v2177_v30  ;;  %v2227_v30 = vpack.c.bf16 %v580_v25, %v548_v24  ;;  %v458_v24 = vld [vmem:[%s2535_s21 + $0x7b8] sm:$0xff]  ;;  %v2301_v26 = vpack.c.bf16 %v393_v21, %v361_v19  ;;  %v300_v19 = vld [vmem:[%s2535_s21 + $0x2c8] sm:$0xff] }
  0x84   : > { %2206 = vmatpush1.bf16.msra.mxu1 %v2205_v31  ;;  %2208 = vmatprep.subr.bf16.mxu0 %v2207_v32  ;;  %v547_v31 = vld [vmem:[%s2535_s21 + $0xa80] sm:$0xff]  ;;  %v302_v21 = vld [vmem:[%s2535_s21 + $0x2d8] sm:$0xff] }
  0x85   : > { %2236 = vmatprep.subr.bf16.mxu1 %v2235_v36  ;;  %v579_v32 = vld [vmem:[%s2535_s21 + $0xb80] sm:$0xff]  ;;  %v612_v36 = vld [vmem:[%s2535_s21 + $0xc88] sm:$0xff] }
  0x86   : > { %1970 = vmatmul.mubr.msk.f32.vlgmr.msra.gmra.mrb[6].mxu0 %vm665_vm0, %v2608_v38  ;;  %v2229_v41 = vpack.c.bf16 %v579_v32, %v547_v31  ;;  %v457_v32 = vld [vmem:[%s2535_s21 + $0x7b0] sm:$0xff] }
  0x87   : > { %1971 = vmatmul.mubr.msk.f32.vlgmr.msra.gmra.mrb[6].mxu1 %vm665_vm0, %v2608_v38  ;;  %2210 = vmatpush1.bf16.msra.mxu0 %v2209_v43  ;;  %v2231_v43 = vpack.c.bf16 %v644_v37, %v612_v36  ;;  %v522_v36 = vld [vmem:[%s2535_s21 + $0x9b8] sm:$0xff] }
  0x88   : > { %2238 = vmatpush1.bf16.msra.mxu1 %v2237_v44  ;;  %2212 = vmatprep.subr.bf16.mxu0 %v2211_v45  ;;  %v611_v44 = vld [vmem:[%s2535_s21 + $0xc80] sm:$0xff] }
  0x89   : > { %2240 = vmatprep.subr.bf16.mxu1 %v2239_v49  ;;  %1301 = vmatprep.mubr.f32.mxu0 %v2484_v1  ;;  %v643_v45 = vld [vmem:[%s2535_s21 + $0xd80] sm:$0xff]  ;;  %v232_v49 = vld [vmem:[%s2535_s21 + $0xa8] sm:$0xff] }
  0x8a   : > { %1372 = vmatprep.mubr.f32.mxu1 %v2484_v1  ;;  %v2233_v53 = vpack.c.bf16 %v643_v45, %v611_v44  ;;  %v2307_v44 = vpack.c.bf16 %v522_v36, %v490_v35  ;;  %v521_v45 = vld [vmem:[%s2535_s21 + $0x9b0] sm:$0xff] }
  0x8b   : > { %2214 = vmatpush1.bf16.msra.mxu0 %v2213_v55  ;;  %v2263_v55 = vpack.c.bf16 %v264_v50, %v232_v49  ;;  %v586_v49 = vld [vmem:[%s2535_s21 + $0xbb8] sm:$0xff] }
  0x8c   : > { %2242 = vmatpush1.bf16.msra.mxu1 %v2241_v56  ;;  %2216 = vmatprep.subr.bf16.mxu0 %v2215_v57  ;;  %v231_v56 = vld [vmem:[%s2535_s21 + $0xa0] sm:$0xff] }
  0x8d   : > { %2244 = vmatprep.subr.bf16.mxu1 %v2243_v61  ;;  %v263_v57 = vld [vmem:[%s2535_s21 + $0x1a0] sm:$0xff]  ;;  %v296_v61 = vld [vmem:[%s2535_s21 + $0x2a8] sm:$0xff] }
  0x8e   : > { %v2265_v2 = vpack.c.bf16 %v263_v57, %v231_v56  ;;  %v2311_v56 = vpack.c.bf16 %v586_v49, %v554_v48  ;;  %v585_v57 = vld [vmem:[%s2535_s21 + $0xbb0] sm:$0xff] }
  0x8f   : > { %2218 = vmatpush1.bf16.msra.mxu0 %v2217_v4  ;;  %v2267_v4 = vpack.c.bf16 %v328_v62, %v296_v61  ;;  %v650_v61 = vld [vmem:[%s2535_s21 + $0xdb8] sm:$0xff] }
  0x90   : > { %2246 = vmatpush1.bf16.msra.mxu1 %v2245_v5  ;;  %2220 = vmatprep.subr.bf16.mxu0 %v2219_v6  ;;  %v295_v5 = vld [vmem:[%s2535_s21 + $0x2a0] sm:$0xff] }
  0x91   : > { %2248 = vmatprep.subr.bf16.mxu1 %v2247_v10  ;;  %v327_v6 = vld [vmem:[%s2535_s21 + $0x3a0] sm:$0xff]  ;;  %v360_v10 = vld [vmem:[%s2535_s21 + $0x4a8] sm:$0xff] }
  0x92   : > { %v2269_v14 = vpack.c.bf16 %v327_v6, %v295_v5  ;;  %v2315_v5 = vpack.c.bf16 %v650_v61, %v618_v60  ;;  %v649_v6 = vld [vmem:[%s2535_s21 + $0xdb0] sm:$0xff] }
  0x93   : > { %2222 = vmatpush1.bf16.msra.mxu0 %v2221_v16  ;;  %v2271_v16 = vpack.c.bf16 %v392_v11, %v360_v10  ;;  %v270_v10 = vld [vmem:[%s2535_s21 + $0x1d8] sm:$0xff] }
  0x94   : > { %2250 = vmatpush1.bf16.msra.mxu1 %v2249_v17  ;;  %2224 = vmatprep.subr.bf16.mxu0 %v2223_v18  ;;  %v359_v17 = vld [vmem:[%s2535_s21 + $0x4a0] sm:$0xff] }
  0x95   : > { %2252 = vmatprep.subr.bf16.mxu1 %v2251_v22  ;;  %v391_v18 = vld [vmem:[%s2535_s21 + $0x5a0] sm:$0xff]  ;;  %v424_v22 = vld [vmem:[%s2535_s21 + $0x6a8] sm:$0xff] }
  0x96   : > { %v2273_v25 = vpack.c.bf16 %v391_v18, %v359_v17  ;;  %v2275_v27 = vpack.c.bf16 %v456_v23, %v424_v22  ;;  %v2347_v17 = vpack.c.bf16 %v270_v10, %v238_v9  ;;  %v269_v18 = vld [vmem:[%s2535_s21 + $0x1d0] sm:$0xff]  ;;  %v334_v22 = vld [vmem:[%s2535_s21 + $0x3d8] sm:$0xff] }
  0x97   : > { %2226 = vmatpush1.bf16.msra.mxu0 %v2225_v28  ;;  %v423_v28 = vld [vmem:[%s2535_s21 + $0x6a0] sm:$0xff] }
  0x98   : > { %2254 = vmatpush1.bf16.msra.mxu1 %v2253_v29  ;;  %2228 = vmatprep.subr.bf16.mxu0 %v2227_v30  ;;  %v455_v29 = vld [vmem:[%s2535_s21 + $0x7a0] sm:$0xff]  ;;  %v425_v30 = vld [vmem:[%s2535_s21 + $0x6b0] sm:$0xff] }
  0x99   : > { %2256 = vmatprep.subr.bf16.mxu1 %v2255_v34  ;;  %v520_v34 = vld [vmem:[%s2535_s21 + $0x9a8] sm:$0xff]  ;;  %v2277_v37 = vpack.c.bf16 %v455_v29, %v423_v28  ;;  %v2305_v39 = vpack.c.bf16 %v457_v32, %v425_v30  ;;  %v2351_v28 = vpack.c.bf16 %v334_v22, %v302_v21  ;;  %v333_v29 = vld [vmem:[%s2535_s21 + $0x3d0] sm:$0xff]  ;;  %v2929_v32 = vld [vmem:[%s3122_s0] sm:$0xff] }
  0x9a   : > { %v2279_v40 = vpack.c.bf16 %v520_v34, %v488_v33  ;;  %v364_v30 = vld [vmem:[%s2535_s21 + $0x4c8] sm:$0xff]  ;;  %v366_v33 = vld [vmem:[%s2535_s21 + $0x4d8] sm:$0xff] }
  0x9b   : > { %2230 = vmatpush1.bf16.msra.mxu0 %v2229_v41  ;;  %v487_v41 = vld [vmem:[%s2535_s21 + $0x8a0] sm:$0xff]  ;;  %v398_v34 = vld [vmem:[%s2535_s21 + $0x5d8] sm:$0xff] }
  0x9c   : > { %2258 = vmatpush1.bf16.msra.mxu1 %v2257_v42  ;;  %2232 = vmatprep.subr.bf16.mxu0 %v2231_v43  ;;  %v519_v42 = vld [vmem:[%s2535_s21 + $0x9a0] sm:$0xff]  ;;  %v489_v43 = vld [vmem:[%s2535_s21 + $0x8b0] sm:$0xff] }
  0x9d   : > { %2260 = vmatprep.subr.bf16.mxu1 %v2259_v47  ;;  %v584_v47 = vld [vmem:[%s2535_s21 + $0xba8] sm:$0xff]  ;;  %v2281_v50 = vpack.c.bf16 %v519_v42, %v487_v41  ;;  %v2309_v51 = vpack.c.bf16 %v521_v45, %v489_v43  ;;  %v365_v41 = vld [vmem:[%s2535_s21 + $0x4d0] sm:$0xff]  ;;  %v2355_v42 = vpack.c.bf16 %v398_v34, %v366_v33 }
  0x9e   : > { %v2283_v52 = vpack.c.bf16 %v584_v47, %v552_v46  ;;  %v397_v43 = vld [vmem:[%s2535_s21 + $0x5d0] sm:$0xff]  ;;  %v460_v45 = vld [vmem:[%s2535_s21 + $0x7c8] sm:$0xff]  ;;  %v430_v46 = vld [vmem:[%s2535_s21 + $0x6d8] sm:$0xff] }
  0x9f   : > { %2234 = vmatpush1.bf16.msra.mxu0 %v2233_v53  ;;  %v551_v53 = vld [vmem:[%s2535_s21 + $0xaa0] sm:$0xff]  ;;  %v462_v47 = vld [vmem:[%s2535_s21 + $0x7d8] sm:$0xff]  ;;  %v2357_v49 = vpack.c.bf16 %v397_v43, %v365_v41  ;;  %v273_v41 = vld [vmem:[%s2535_s21 + $0x1f0] sm:$0xff] }
  0xa0   : > { %2262 = vmatpush1.bf16.msra.mxu1 %v2261_v54  ;;  %2264 = vmatprep.subr.bf16.mxu0 %v2263_v55  ;;  %v583_v54 = vld [vmem:[%s2535_s21 + $0xba0] sm:$0xff]  ;;  %v553_v55 = vld [vmem:[%s2535_s21 + $0xab0] sm:$0xff]  ;;  %v336_v43 = vld [vmem:[%s2535_s21 + $0x3e8] sm:$0xff] }
  0xa1   : > { %2292 = vmatprep.subr.bf16.mxu1 %v2291_v59  ;;  %v648_v59 = vld [vmem:[%s2535_s21 + $0xda8] sm:$0xff]  ;;  %v2285_v62 = vpack.c.bf16 %v583_v54, %v551_v53  ;;  %v2313_v63 = vpack.c.bf16 %v585_v57, %v553_v55  ;;  %v429_v53 = vld [vmem:[%s2535_s21 + $0x6d0] sm:$0xff]  ;;  %v2359_v54 = vpack.c.bf16 %v462_v47, %v430_v46 }
  0xa2   : > { %1972 = vmatmul.mubr.msk.f32.vlgmr.msra.gmra.mrb[8].mxu0 %vm665_vm0, %v2608_v38  ;;  %v2287_v0 = vpack.c.bf16 %v648_v59, %v616_v58  ;;  %v461_v55 = vld [vmem:[%s2535_s21 + $0x7d0] sm:$0xff]  ;;  %v524_v57 = vld [vmem:[%s2535_s21 + $0x9c8] sm:$0xff]  ;;  %v494_v58 = vld [vmem:[%s2535_s21 + $0x8d8] sm:$0xff] }
  0xa3   : > { %1973 = vmatmul.mubr.msk.f32.vlgmr.msra.gmra.mrb[8].mxu1 %vm665_vm0, %v2608_v38  ;;  %2266 = vmatpush1.bf16.msra.mxu0 %v2265_v2  ;;  %v426_v38 = vld [vmem:[%s2535_s21 + $0x6b8] sm:$0xff]  ;;  %v615_v2 = vld [vmem:[%s2535_s21 + $0xca0] sm:$0xff]  ;;  %v2361_v61 = vpack.c.bf16 %v461_v55, %v429_v53  ;;  %v337_v53 = vld [vmem:[%s2535_s21 + $0x3f0] sm:$0xff] }
  0xa4   : > { %2294 = vmatpush1.bf16.msra.mxu1 %v2293_v3  ;;  %2268 = vmatprep.subr.bf16.mxu0 %v2267_v4  ;;  %v2303_v31 = vpack.c.bf16 %v458_v24, %v426_v38  ;;  %v647_v3 = vld [vmem:[%s2535_s21 + $0xda0] sm:$0xff]  ;;  %v617_v4 = vld [vmem:[%s2535_s21 + $0xcb0] sm:$0xff]  ;;  %v526_v59 = vld [vmem:[%s2535_s21 + $0x9d8] sm:$0xff] }
  0xa5   : > { %2296 = vmatprep.subr.bf16.mxu1 %v2295_v8  ;;  %1443 = vmatprep.mubr.f32.mxu0 %v2484_v1  ;;  %v268_v8 = vld [vmem:[%s2535_s21 + $0x1c8] sm:$0xff]  ;;  %v2289_v11 = vpack.c.bf16 %v647_v3, %v615_v2  ;;  %v2317_v12 = vpack.c.bf16 %v649_v6, %v617_v4  ;;  %v493_v2 = vld [vmem:[%s2535_s21 + $0x8d0] sm:$0xff]  ;;  %v2363_v3 = vpack.c.bf16 %v526_v59, %v494_v58 }
  0xa6   : > { %1514 = vmatprep.mubr.f32.mxu1 %v2484_v1  ;;  %v2319_v13 = vpack.c.bf16 %v268_v8, %v236_v7  ;;  %v525_v4 = vld [vmem:[%s2535_s21 + $0x9d0] sm:$0xff]  ;;  %v588_v6 = vld [vmem:[%s2535_s21 + $0xbc8] sm:$0xff]  ;;  %v558_v7 = vld [vmem:[%s2535_s21 + $0xad8] sm:$0xff] }
  0xa7   : > { %2270 = vmatpush1.bf16.msra.mxu0 %v2269_v14  ;;  %v235_v14 = vld [vmem:[%s2535_s21 + $0xc0] sm:$0xff]  ;;  %v590_v8 = vld [vmem:[%s2535_s21 + $0xbd8] sm:$0xff]  ;;  %v2365_v10 = vpack.c.bf16 %v525_v4, %v493_v2  ;;  %v400_v55 = vld [vmem:[%s2535_s21 + $0x5e8] sm:$0xff] }
  0xa8   : > { %2298 = vmatpush1.bf16.msra.mxu1 %v2297_v15  ;;  %2272 = vmatprep.subr.bf16.mxu0 %v2271_v16  ;;  %v267_v15 = vld [vmem:[%s2535_s21 + $0x1c0] sm:$0xff]  ;;  %v237_v16 = vld [vmem:[%s2535_s21 + $0xd0] sm:$0xff]  ;;  %v464_v4 = vld [vmem:[%s2535_s21 + $0x7e8] sm:$0xff] }
  0xa9   : > { %2300 = vmatprep.subr.bf16.mxu1 %v2299_v20  ;;  %v332_v20 = vld [vmem:[%s2535_s21 + $0x3c8] sm:$0xff]  ;;  %v2321_v23 = vpack.c.bf16 %v267_v15, %v235_v14  ;;  %v2349_v38 = vpack.c.bf16 %v269_v18, %v237_v16  ;;  %v557_v14 = vld [vmem:[%s2535_s21 + $0xad0] sm:$0xff]  ;;  %v2367_v15 = vpack.c.bf16 %v590_v8, %v558_v7 }
  0xaa   : > { %v2323_v24 = vpack.c.bf16 %v332_v20, %v300_v19  ;;  %v589_v16 = vld [vmem:[%s2535_s21 + $0xbd0] sm:$0xff]  ;;  %v652_v18 = vld [vmem:[%s2535_s21 + $0xdc8] sm:$0xff]  ;;  %v622_v19 = vld [vmem:[%s2535_s21 + $0xcd8] sm:$0xff] }
  0xab   : > { %2274 = vmatpush1.bf16.msra.mxu0 %v2273_v25  ;;  %v299_v25 = vld [vmem:[%s2535_s21 + $0x2c0] sm:$0xff]  ;;  %v654_v20 = vld [vmem:[%s2535_s21 + $0xdd8] sm:$0xff]  ;;  %v2369_v22 = vpack.c.bf16 %v589_v16, %v557_v14  ;;  %v401_v2 = vld [vmem:[%s2535_s21 + $0x5f0] sm:$0xff] }
  0xac   : > { %2302 = vmatpush1.bf16.msra.mxu1 %v2301_v26  ;;  %2276 = vmatprep.subr.bf16.mxu0 %v2275_v27  ;;  %v331_v26 = vld [vmem:[%s2535_s21 + $0x3c0] sm:$0xff]  ;;  %v301_v27 = vld [vmem:[%s2535_s21 + $0x2d0] sm:$0xff]  ;;  %v498_v16 = vld [vmem:[%s2535_s21 + $0x8f8] sm:$0xff] }
  0xad   : > { %2304 = vmatprep.subr.bf16.mxu1 %v2303_v31  ;;  %v396_v31 = vld [vmem:[%s2535_s21 + $0x5c8] sm:$0xff]  ;;  %v2325_v35 = vpack.c.bf16 %v331_v26, %v299_v25  ;;  %v2353_v36 = vpack.c.bf16 %v333_v29, %v301_v27  ;;  %v621_v25 = vld [vmem:[%s2535_s21 + $0xcd0] sm:$0xff]  ;;  %v2371_v26 = vpack.c.bf16 %v654_v20, %v622_v19 }
  0xae   : > { %v653_v27 = vld [vmem:[%s2535_s21 + $0xdd0] sm:$0xff]  ;;  %v272_v29 = vld [vmem:[%s2535_s21 + $0x1e8] sm:$0xff] }
  0xaf   : > { %2278 = vmatpush1.bf16.msra.mxu0 %v2277_v37  ;;  %v2327_v37 = vpack.c.bf16 %v396_v31, %v364_v30  ;;  %v242_v30 = vld [vmem:[%s2535_s21 + $0xf8] sm:$0xff]  ;;  %v2373_v34 = vpack.c.bf16 %v653_v27, %v621_v25  ;;  %v465_v14 = vld [vmem:[%s2535_s21 + $0x7f0] sm:$0xff]  ;;  %v560_v25 = vld [vmem:[%s2535_s21 + $0xae8] sm:$0xff] }
  0xb0   : > { %2306 = vmatpush1.bf16.msra.mxu1 %v2305_v39  ;;  %2280 = vmatprep.subr.bf16.mxu0 %v2279_v40  ;;  %v363_v39 = vld [vmem:[%s2535_s21 + $0x4c0] sm:$0xff]  ;;  %v274_v31 = vld [vmem:[%s2535_s21 + $0x1f8] sm:$0xff] }
  0xb1   : > { %2308 = vmatprep.subr.bf16.mxu1 %v2307_v44  ;;  %v395_v40 = vld [vmem:[%s2535_s21 + $0x5c0] sm:$0xff]  ;;  %v428_v44 = vld [vmem:[%s2535_s21 + $0x6c8] sm:$0xff]  ;;  %v562_v27 = vld [vmem:[%s2535_s21 + $0xaf8] sm:$0xff] }
  0xb2   : > { %v2329_v48 = vpack.c.bf16 %v395_v40, %v363_v39  ;;  %v241_v39 = vld [vmem:[%s2535_s21 + $0xf0] sm:$0xff]  ;;  %v2403_v40 = vpack.c.bf16 %v274_v31, %v242_v30 }
  0xb3   : > { %2282 = vmatpush1.bf16.msra.mxu0 %v2281_v50  ;;  %v2331_v50 = vpack.c.bf16 %v460_v45, %v428_v44  ;;  %v306_v44 = vld [vmem:[%s2535_s21 + $0x2f8] sm:$0xff]  ;;  %v2405_v47 = vpack.c.bf16 %v273_v41, %v241_v39  ;;  %v624_v39 = vld [vmem:[%s2535_s21 + $0xce8] sm:$0xff] }
  0xb4   : > { %2310 = vmatpush1.bf16.msra.mxu1 %v2309_v51  ;;  %2284 = vmatprep.subr.bf16.mxu0 %v2283_v52  ;;  %v427_v51 = vld [vmem:[%s2535_s21 + $0x6c0] sm:$0xff]  ;;  %v338_v45 = vld [vmem:[%s2535_s21 + $0x3f8] sm:$0xff] }
  0xb5   : > { %2312 = vmatprep.subr.bf16.mxu1 %v2311_v56  ;;  %v459_v52 = vld [vmem:[%s2535_s21 + $0x7c0] sm:$0xff]  ;;  %v492_v56 = vld [vmem:[%s2535_s21 + $0x8c8] sm:$0xff]  ;;  %v626_v41 = vld [vmem:[%s2535_s21 + $0xcf8] sm:$0xff] }
  0xb6   : > { %v2333_v60 = vpack.c.bf16 %v459_v52, %v427_v51  ;;  %v305_v51 = vld [vmem:[%s2535_s21 + $0x2f0] sm:$0xff]  ;;  %v2407_v52 = vpack.c.bf16 %v338_v45, %v306_v44 }
  0xb7   : > { %2286 = vmatpush1.bf16.msra.mxu0 %v2285_v62  ;;  %v2335_v62 = vpack.c.bf16 %v524_v57, %v492_v56  ;;  %v370_v56 = vld [vmem:[%s2535_s21 + $0x4f8] sm:$0xff]  ;;  %v2409_v59 = vpack.c.bf16 %v337_v53, %v305_v51  ;;  %v3041_v53 = vpop.permute.xlu0 %662 }
  0xb8   : > { %2314 = vmatpush1.bf16.msra.mxu1 %v2313_v63  ;;  %2288 = vmatprep.subr.bf16.mxu0 %v2287_v0  ;;  %v491_v63 = vld [vmem:[%s2535_s21 + $0x8c0] sm:$0xff]  ;;  %v402_v57 = vld [vmem:[%s2535_s21 + $0x5f8] sm:$0xff] }
  0xb9   : > { %2316 = vmatprep.subr.bf16.mxu1 %v2315_v5  ;;  %v523_v0 = vld [vmem:[%s2535_s21 + $0x9c0] sm:$0xff]  ;;  %v556_v5 = vld [vmem:[%s2535_s21 + $0xac8] sm:$0xff] }
  0xba   : > { %v2337_v9 = vpack.c.bf16 %v523_v0, %v491_v63  ;;  %v369_v63 = vld [vmem:[%s2535_s21 + $0x4f0] sm:$0xff]  ;;  %v2411_v0 = vpack.c.bf16 %v402_v57, %v370_v56 }
  0xbb   : > { %2290 = vmatpush1.bf16.msra.mxu0 %v2289_v11  ;;  %v2339_v11 = vpack.c.bf16 %v588_v6, %v556_v5  ;;  %v434_v5 = vld [vmem:[%s2535_s21 + $0x6f8] sm:$0xff]  ;;  %v2413_v8 = vpack.c.bf16 %v401_v2, %v369_v63 }
  0xbc   : > { %2318 = vmatpush1.bf16.msra.mxu1 %v2317_v12  ;;  %2320 = vmatprep.subr.bf16.mxu0 %v2319_v13  ;;  %v555_v12 = vld [vmem:[%s2535_s21 + $0xac0] sm:$0xff]  ;;  %v466_v6 = vld [vmem:[%s2535_s21 + $0x7f8] sm:$0xff] }
  0xbd   : > { %2348 = vmatprep.subr.bf16.mxu1 %v2347_v17  ;;  %v587_v13 = vld [vmem:[%s2535_s21 + $0xbc0] sm:$0xff]  ;;  %v620_v17 = vld [vmem:[%s2535_s21 + $0xcc8] sm:$0xff] }
  0xbe   : > { %1974 = vmatmul.mubr.msk.f32.vlgmr.msra.gmra.mrb[10].mxu0 %vm665_vm0, %v2929_v32  ;;  %v2341_v21 = vpack.c.bf16 %v587_v13, %v555_v12  ;;  %v433_v12 = vld [vmem:[%s2535_s21 + $0x6f0] sm:$0xff]  ;;  %v2415_v13 = vpack.c.bf16 %v466_v6, %v434_v5 }
  0xbf   : > { %1975 = vmatmul.mubr.msk.f32.vlgmr.msra.gmra.mrb[10].mxu1 %vm665_vm0, %v2929_v32  ;;  %2322 = vmatpush1.bf16.msra.mxu0 %v2321_v23  ;;  %v2343_v23 = vpack.c.bf16 %v652_v18, %v620_v17  ;;  %v530_v17 = vld [vmem:[%s2535_s21 + $0x9f8] sm:$0xff]  ;;  %v2417_v19 = vpack.c.bf16 %v465_v14, %v433_v12 }
  0xc0   : > { %2350 = vmatpush1.bf16.msra.mxu1 %v2349_v38  ;;  %2324 = vmatprep.subr.bf16.mxu0 %v2323_v24  ;;  %v619_v38 = vld [vmem:[%s2535_s21 + $0xcc0] sm:$0xff] }
  0xc1   : > { %2352 = vmatprep.subr.bf16.mxu1 %v2351_v28  ;;  %1585 = vmatprep.mubr.f32.mxu0 %v2484_v1  ;;  %v651_v24 = vld [vmem:[%s2535_s21 + $0xdc0] sm:$0xff]  ;;  %v240_v28 = vld [vmem:[%s2535_s21 + $0xe8] sm:$0xff] }
  0xc2   : > { %1656 = vmatprep.mubr.f32.mxu1 %v2484_v1  ;;  %v2345_v33 = vpack.c.bf16 %v651_v24, %v619_v38  ;;  %v2419_v38 = vpack.c.bf16 %v530_v17, %v498_v16  ;;  %v529_v24 = vld [vmem:[%s2535_s21 + $0x9f0] sm:$0xff] }
  0xc3   : > { %2326 = vmatpush1.bf16.msra.mxu0 %v2325_v35  ;;  %v2375_v35 = vpack.c.bf16 %v272_v29, %v240_v28  ;;  %v594_v28 = vld [vmem:[%s2535_s21 + $0xbf8] sm:$0xff] }
  0xc4   : > { %2354 = vmatpush1.bf16.msra.mxu1 %v2353_v36  ;;  %2328 = vmatprep.subr.bf16.mxu0 %v2327_v37  ;;  %v239_v36 = vld [vmem:[%s2535_s21 + $0xe0] sm:$0xff] }
  0xc5   : > { %2356 = vmatprep.subr.bf16.mxu1 %v2355_v42  ;;  %v271_v37 = vld [vmem:[%s2535_s21 + $0x1e0] sm:$0xff]  ;;  %v304_v42 = vld [vmem:[%s2535_s21 + $0x2e8] sm:$0xff] }
  0xc6   : > { %v2377_v46 = vpack.c.bf16 %v271_v37, %v239_v36  ;;  %v2423_v36 = vpack.c.bf16 %v594_v28, %v562_v27  ;;  %v593_v37 = vld [vmem:[%s2535_s21 + $0xbf0] sm:$0xff] }
  0xc7   : > { %2330 = vmatpush1.bf16.msra.mxu0 %v2329_v48  ;;  %v2379_v48 = vpack.c.bf16 %v336_v43, %v304_v42  ;;  %v658_v42 = vld [vmem:[%s2535_s21 + $0xdf8] sm:$0xff] }
  0xc8   : > { %2358 = vmatpush1.bf16.msra.mxu1 %v2357_v49  ;;  %2332 = vmatprep.subr.bf16.mxu0 %v2331_v50  ;;  %v303_v49 = vld [vmem:[%s2535_s21 + $0x2e0] sm:$0xff] }
  0xc9   : > { %2360 = vmatprep.subr.bf16.mxu1 %v2359_v54  ;;  %v335_v50 = vld [vmem:[%s2535_s21 + $0x3e0] sm:$0xff]  ;;  %v368_v54 = vld [vmem:[%s2535_s21 + $0x4e8] sm:$0xff] }
  0xca   : > { %v2381_v58 = vpack.c.bf16 %v335_v50, %v303_v49  ;;  %v625_v49 = vld [vmem:[%s2535_s21 + $0xcf0] sm:$0xff] }
  0xcb   : > { %2334 = vmatpush1.bf16.msra.mxu0 %v2333_v60  ;;  %v2383_v60 = vpack.c.bf16 %v400_v55, %v368_v54  ;;  %v657_v50 = vld [vmem:[%s2535_s21 + $0xdf0] sm:$0xff] }
  0xcc   : > { %2362 = vmatpush1.bf16.msra.mxu1 %v2361_v61  ;;  %2336 = vmatprep.subr.bf16.mxu0 %v2335_v62  ;;  %v367_v61 = vld [vmem:[%s2535_s21 + $0x4e0] sm:$0xff] }
  0xcd   : > { %2364 = vmatprep.subr.bf16.mxu1 %v2363_v3  ;;  %v399_v62 = vld [vmem:[%s2535_s21 + $0x5e0] sm:$0xff]  ;;  %v432_v3 = vld [vmem:[%s2535_s21 + $0x6e8] sm:$0xff] }
  0xce   : > { %v2385_v7 = vpack.c.bf16 %v399_v62, %v367_v61 }
  0xcf   : > { %2338 = vmatpush1.bf16.msra.mxu0 %v2337_v9  ;;  %v2387_v9 = vpack.c.bf16 %v464_v4, %v432_v3 }
  0xd0   : > { %2366 = vmatpush1.bf16.msra.mxu1 %v2365_v10  ;;  %2340 = vmatprep.subr.bf16.mxu0 %v2339_v11  ;;  %v431_v10 = vld [vmem:[%s2535_s21 + $0x6e0] sm:$0xff] }
  0xd1   : > { %2368 = vmatprep.subr.bf16.mxu1 %v2367_v15  ;;  %v463_v11 = vld [vmem:[%s2535_s21 + $0x7e0] sm:$0xff]  ;;  %v496_v15 = vld [vmem:[%s2535_s21 + $0x8e8] sm:$0xff] }
  0xd2   : > { %v2389_v18 = vpack.c.bf16 %v463_v11, %v431_v10 }
  0xd3   : > { %2342 = vmatpush1.bf16.msra.mxu0 %v2341_v21  ;;  %v495_v21 = vld [vmem:[%s2535_s21 + $0x8e0] sm:$0xff] }
  0xd4   : > { %2370 = vmatpush1.bf16.msra.mxu1 %v2369_v22  ;;  %2344 = vmatprep.subr.bf16.mxu0 %v2343_v23  ;;  %v527_v22 = vld [vmem:[%s2535_s21 + $0x9e0] sm:$0xff]  ;;  %v497_v23 = vld [vmem:[%s2535_s21 + $0x8f0] sm:$0xff] }
  0xd5   : > { %2372 = vmatprep.subr.bf16.mxu1 %v2371_v26  ;;  %v592_v26 = vld [vmem:[%s2535_s21 + $0xbe8] sm:$0xff]  ;;  %v2393_v29 = vpack.c.bf16 %v527_v22, %v495_v21  ;;  %v2421_v30 = vpack.c.bf16 %v529_v24, %v497_v23 }
  0xd6   : > { %v2395_v31 = vpack.c.bf16 %v592_v26, %v560_v25 }
  0xd7   : > { %2346 = vmatpush1.bf16.msra.mxu0 %v2345_v33  ;;  %v559_v33 = vld [vmem:[%s2535_s21 + $0xae0] sm:$0xff] }
  0xd8   : > { %2374 = vmatpush1.bf16.msra.mxu1 %v2373_v34  ;;  %2376 = vmatprep.subr.bf16.mxu0 %v2375_v35  ;;  %v591_v34 = vld [vmem:[%s2535_s21 + $0xbe0] sm:$0xff]  ;;  %v561_v35 = vld [vmem:[%s2535_s21 + $0xaf0] sm:$0xff] }
  0xd9   : > { %2404 = vmatprep.subr.bf16.mxu1 %v2403_v40  ;;  %v656_v40 = vld [vmem:[%s2535_s21 + $0xde8] sm:$0xff]  ;;  %v2397_v43 = vpack.c.bf16 %v591_v34, %v559_v33  ;;  %v2425_v44 = vpack.c.bf16 %v593_v37, %v561_v35 }
  0xda   : > { %1976 = vmatmul.mubr.msk.f32.vlgmr.msra.gmra.mrb[12].mxu0 %vm665_vm0, %v2929_v32  ;;  %v2399_v45 = vpack.c.bf16 %v656_v40, %v624_v39 }
  0xdb   : > { %1977 = vmatmul.mubr.msk.f32.vlgmr.msra.gmra.mrb[12].mxu1 %vm665_vm0, %v2929_v32  ;;  %2378 = vmatpush1.bf16.msra.mxu0 %v2377_v46  ;;  %v623_v46 = vld [vmem:[%s2535_s21 + $0xce0] sm:$0xff] }
  0xdc   : > { %2406 = vmatpush1.bf16.msra.mxu1 %v2405_v47  ;;  %2380 = vmatprep.subr.bf16.mxu0 %v2379_v48  ;;  %v655_v47 = vld [vmem:[%s2535_s21 + $0xde0] sm:$0xff]  ;;  %v2427_v48 = vpack.c.bf16 %v658_v42, %v626_v41 }
  0xdd   : > { %2408 = vmatprep.subr.bf16.mxu1 %v2407_v52  ;;  %1727 = vmatprep.mubr.f32.mxu0 %v2484_v1  ;;  %v2401_v51 = vpack.c.bf16 %v655_v47, %v623_v46  ;;  %v2429_v52 = vpack.c.bf16 %v657_v50, %v625_v49 }
  0xde   : > { %1798 = vmatprep.mubr.f32.mxu1 %v2484_v1  ;;  %v528_v1 = vld [vmem:[%s2535_s21 + $0x9e8] sm:$0xff] }
  0xdf   : > { %2382 = vmatpush1.bf16.msra.mxu0 %v2381_v58  ;;  %v2391_v20 = vpack.c.bf16 %v528_v1, %v496_v15 }
  0xe0   : > { %2410 = vmatpush1.bf16.msra.mxu1 %v2409_v59  ;;  %2384 = vmatprep.subr.bf16.mxu0 %v2383_v60 }
  0xe1   : > { %2412 = vmatprep.subr.bf16.mxu1 %v2411_v0 }
  0xe3   : > { %2386 = vmatpush1.bf16.msra.mxu0 %v2385_v7 }
  0xe4   : > { %2414 = vmatpush1.bf16.msra.mxu1 %v2413_v8  ;;  %2388 = vmatprep.subr.bf16.mxu0 %v2387_v9 }
  0xe5   : > { %2416 = vmatprep.subr.bf16.mxu1 %v2415_v13 }
  0xe7   : > { %2390 = vmatpush1.bf16.msra.mxu0 %v2389_v18 }
  0xe8   : > { %2418 = vmatpush1.bf16.msra.mxu1 %v2417_v19  ;;  %2392 = vmatprep.subr.bf16.mxu0 %v2391_v20 }
  0xe9   : > { %2420 = vmatprep.subr.bf16.mxu1 %v2419_v38 }
  0xeb   : > { %2394 = vmatpush1.bf16.msra.mxu0 %v2393_v29 }
  0xec   : > { %2422 = vmatpush1.bf16.msra.mxu1 %v2421_v30  ;;  %2396 = vmatprep.subr.bf16.mxu0 %v2395_v31 }
  0xed   : > { %2424 = vmatprep.subr.bf16.mxu1 %v2423_v36 }
  0xef   : > { %2398 = vmatpush1.bf16.msra.mxu0 %v2397_v43 }
  0xf0   : > { %2426 = vmatpush1.bf16.msra.mxu1 %v2425_v44  ;;  %2400 = vmatprep.subr.bf16.mxu0 %v2399_v45 }
  0xf1   : > { %2428 = vmatprep.subr.bf16.mxu1 %v2427_v48 }
  0xf3   : > { %2402 = vmatpush1.bf16.msra.mxu0 %v2401_v51 }
  0xf4   : > { %2430 = vmatpush1.bf16.msra.mxu1 %v2429_v52 }
  0xf6   : > { %1978 = vmatmul.mubr.msk.f32.vlgmr.msra.gmra.mrb[14].mxu0 %vm665_vm0, %v2929_v32 }
  0xf7   : > { %1979 = vmatmul.mubr.msk.f32.vlgmr.msra.gmra.mrb[14].mxu1 %vm665_vm0, %v2929_v32 }
 0x105   : > { %v735_v54 = vpop.f32.mrb[0].mxu0 }
 0x106   : > { %v806_v55 = vpop.f32.mrb[0].mxu1  ;;  %v736_v56 = vadd.f32 %v735_v54, %v3041_v53  ;;  %v737_v57 = vpop.f32.mrb[1].mxu0 }
 0x107   : > { %v807_v58 = vadd.f32 %v806_v55, %v3041_v53  ;;  %v738_v32 = vadd.f32 %v737_v57, %v3041_v53  ;;  %v808_v59 = vpop.f32.mrb[1].mxu1 }
 0x108   : > { %v1805_v60 = vmax.f32 %v736_v56, 0.0  ;;  %v809_v61 = vadd.f32 %v808_v59, %v3041_v53 }
 0x109   : > { %v1807_v62 = vmax.f32 %v807_v58, 0.0  ;;  %v1806_v63 = vmax.f32 %v738_v32, 0.0 }
 0x10a   : > { %1837 = vst [vmem:[%s3048_s29] sm:$0xff] %v1805_v60  ;;  %v1808_v0 = vmax.f32 %v809_v61, 0.0 }
 0x10b   : > { %1839 = vst [vmem:[%s3048_s29 + $0x10] sm:$0xff] %v1807_v62  ;;  %1838 = vst [vmem:[%s3048_s29 + $0x8] sm:$0xff] %v1806_v63 }
 0x10c   : > { %1840 = vst [vmem:[%s3048_s29 + $0x18] sm:$0xff] %v1808_v0 }
 0x121   : > { %v877_v2 = vpop.f32.mrb[2].mxu0 }
 0x122   : > { %v878_v3 = vadd.f32 %v877_v2, %v3041_v53  ;;  %v948_v4 = vpop.f32.mrb[2].mxu1  ;;  %v879_v5 = vpop.f32.mrb[3].mxu0 }
 0x123   : > { %v949_v6 = vadd.f32 %v948_v4, %v3041_v53  ;;  %v880_v7 = vadd.f32 %v879_v5, %v3041_v53  ;;  %v950_v8 = vpop.f32.mrb[3].mxu1 }
 0x124   : > { %v1809_v9 = vmax.f32 %v878_v3, 0.0  ;;  %v951_v10 = vadd.f32 %v950_v8, %v3041_v53 }
 0x125   : > { %v1811_v11 = vmax.f32 %v949_v6, 0.0  ;;  %v1810_v12 = vmax.f32 %v880_v7, 0.0 }
 0x126   : > { %1841 = vst [vmem:[%s3048_s29 + $0x20] sm:$0xff] %v1809_v9  ;;  %v1812_v13 = vmax.f32 %v951_v10, 0.0 }
 0x127   : > { %1843 = vst [vmem:[%s3048_s29 + $0x30] sm:$0xff] %v1811_v11  ;;  %1842 = vst [vmem:[%s3048_s29 + $0x28] sm:$0xff] %v1810_v12 }
 0x128   : > { %1844 = vst [vmem:[%s3048_s29 + $0x38] sm:$0xff] %v1812_v13 }
 0x13d   : > { %v1019_v14 = vpop.f32.mrb[4].mxu0 }
 0x13e   : > { %v1020_v15 = vadd.f32 %v1019_v14, %v3041_v53  ;;  %v1090_v1 = vpop.f32.mrb[4].mxu1  ;;  %v1021_v16 = vpop.f32.mrb[5].mxu0 }
 0x13f   : > { %v1091_v17 = vadd.f32 %v1090_v1, %v3041_v53  ;;  %v1022_v18 = vadd.f32 %v1021_v16, %v3041_v53  ;;  %v1092_v19 = vpop.f32.mrb[5].mxu1 }
 0x140   : > { %v1813_v20 = vmax.f32 %v1020_v15, 0.0  ;;  %v1093_v21 = vadd.f32 %v1092_v19, %v3041_v53 }
 0x141   : > { %v1815_v22 = vmax.f32 %v1091_v17, 0.0  ;;  %v1814_v23 = vmax.f32 %v1022_v18, 0.0 }
 0x142   : > { %1845 = vst [vmem:[%s3048_s29 + $0x40] sm:$0xff] %v1813_v20  ;;  %v1816_v38 = vmax.f32 %v1093_v21, 0.0 }
 0x143   : > { %1847 = vst [vmem:[%s3048_s29 + $0x50] sm:$0xff] %v1815_v22  ;;  %1846 = vst [vmem:[%s3048_s29 + $0x48] sm:$0xff] %v1814_v23 }
 0x144   : > { %1848 = vst [vmem:[%s3048_s29 + $0x58] sm:$0xff] %v1816_v38 }
 0x159   : > { %v1161_v24 = vpop.f32.mrb[6].mxu0 }
 0x15a   : > { %v1162_v25 = vadd.f32 %v1161_v24, %v3041_v53  ;;  %v1232_v26 = vpop.f32.mrb[6].mxu1  ;;  %v1163_v27 = vpop.f32.mrb[7].mxu0 }
 0x15b   : > { %v1233_v28 = vadd.f32 %v1232_v26, %v3041_v53  ;;  %v1164_v29 = vadd.f32 %v1163_v27, %v3041_v53  ;;  %v1234_v30 = vpop.f32.mrb[7].mxu1 }
 0x15c   : > { %v1817_v31 = vmax.f32 %v1162_v25, 0.0  ;;  %v1235_v33 = vadd.f32 %v1234_v30, %v3041_v53 }
 0x15d   : > { %v1819_v34 = vmax.f32 %v1233_v28, 0.0  ;;  %v1818_v35 = vmax.f32 %v1164_v29, 0.0 }
 0x15e   : > { %1849 = vst [vmem:[%s3048_s29 + $0x60] sm:$0xff] %v1817_v31  ;;  %v1820_v36 = vmax.f32 %v1235_v33, 0.0 }
 0x15f   : > { %1851 = vst [vmem:[%s3048_s29 + $0x70] sm:$0xff] %v1819_v34  ;;  %1850 = vst [vmem:[%s3048_s29 + $0x68] sm:$0xff] %v1818_v35 }
 0x160   : > { %1852 = vst [vmem:[%s3048_s29 + $0x78] sm:$0xff] %v1820_v36 }
 0x175   : > { %v1303_v37 = vpop.f32.mrb[8].mxu0 }
 0x176   : > { %v1304_v39 = vadd.f32 %v1303_v37, %v3041_v53  ;;  %v1374_v40 = vpop.f32.mrb[8].mxu1  ;;  %v1305_v41 = vpop.f32.mrb[9].mxu0 }
 0x177   : > { %v1375_v42 = vadd.f32 %v1374_v40, %v3041_v53  ;;  %v1306_v43 = vadd.f32 %v1305_v41, %v3041_v53  ;;  %v1376_v44 = vpop.f32.mrb[9].mxu1 }
 0x178   : > { %v1821_v45 = vmax.f32 %v1304_v39, 0.0  ;;  %v1377_v46 = vadd.f32 %v1376_v44, %v3041_v53 }
 0x179   : > { %v1823_v47 = vmax.f32 %v1375_v42, 0.0  ;;  %v1822_v48 = vmax.f32 %v1306_v43, 0.0 }
 0x17a   : > { %1853 = vst [vmem:[%s3048_s29 + $0x80] sm:$0xff] %v1821_v45  ;;  %v1824_v49 = vmax.f32 %v1377_v46, 0.0 }
 0x17b   : > { %1855 = vst [vmem:[%s3048_s29 + $0x90] sm:$0xff] %v1823_v47  ;;  %1854 = vst [vmem:[%s3048_s29 + $0x88] sm:$0xff] %v1822_v48 }
 0x17c   : > { %1856 = vst [vmem:[%s3048_s29 + $0x98] sm:$0xff] %v1824_v49 }
 0x191   : > { %v1445_v50 = vpop.f32.mrb[10].mxu0 }
 0x192   : > { %v1446_v51 = vadd.f32 %v1445_v50, %v3041_v53  ;;  %v1516_v52 = vpop.f32.mrb[10].mxu1  ;;  %v1447_v54 = vpop.f32.mrb[11].mxu0 }
 0x193   : > { %v1517_v55 = vadd.f32 %v1516_v52, %v3041_v53  ;;  %v1448_v56 = vadd.f32 %v1447_v54, %v3041_v53  ;;  %v1518_v57 = vpop.f32.mrb[11].mxu1 }
 0x194   : > { %v1825_v58 = vmax.f32 %v1446_v51, 0.0  ;;  %v1519_v32 = vadd.f32 %v1518_v57, %v3041_v53 }
 0x195   : > { %v1827_v59 = vmax.f32 %v1517_v55, 0.0  ;;  %v1826_v60 = vmax.f32 %v1448_v56, 0.0 }
 0x196   : > { %1857 = vst [vmem:[%s3048_s29 + $0xa0] sm:$0xff] %v1825_v58  ;;  %v1828_v61 = vmax.f32 %v1519_v32, 0.0 }
 0x197   : > { %1859 = vst [vmem:[%s3048_s29 + $0xb0] sm:$0xff] %v1827_v59  ;;  %1858 = vst [vmem:[%s3048_s29 + $0xa8] sm:$0xff] %v1826_v60 }
 0x198   : > { %1860 = vst [vmem:[%s3048_s29 + $0xb8] sm:$0xff] %v1828_v61 }
 0x1ad   : > { %v1587_v62 = vpop.f32.mrb[12].mxu0 }
 0x1ae   : > { %v1588_v63 = vadd.f32 %v1587_v62, %v3041_v53  ;;  %v1658_v0 = vpop.f32.mrb[12].mxu1  ;;  %v1589_v2 = vpop.f32.mrb[13].mxu0 }
 0x1af   : > { %v1659_v3 = vadd.f32 %v1658_v0, %v3041_v53  ;;  %v1590_v4 = vadd.f32 %v1589_v2, %v3041_v53  ;;  %v1660_v5 = vpop.f32.mrb[13].mxu1 }
 0x1b0   : > { %v1829_v6 = vmax.f32 %v1588_v63, 0.0  ;;  %v1661_v7 = vadd.f32 %v1660_v5, %v3041_v53 }
 0x1b1   : > { %v1831_v8 = vmax.f32 %v1659_v3, 0.0  ;;  %v1830_v9 = vmax.f32 %v1590_v4, 0.0 }
 0x1b2   : > { %1861 = vst [vmem:[%s3048_s29 + $0xc0] sm:$0xff] %v1829_v6  ;;  %v1832_v10 = vmax.f32 %v1661_v7, 0.0 }
 0x1b3   : > { %1863 = vst [vmem:[%s3048_s29 + $0xd0] sm:$0xff] %v1831_v8  ;;  %1862 = vst [vmem:[%s3048_s29 + $0xc8] sm:$0xff] %v1830_v9 }
 0x1b4   : > { %1864 = vst [vmem:[%s3048_s29 + $0xd8] sm:$0xff] %v1832_v10 }
 0x1c9   : > { %v1729_v11 = vpop.f32.mrb[14].mxu0 }
 0x1ca   : > { %v1730_v12 = vadd.f32 %v1729_v11, %v3041_v53  ;;  %v1800_v13 = vpop.f32.mrb[14].mxu1  ;;  %v1731_v14 = vpop.f32.mrb[15].mxu0 }
 0x1cb   : > { %v1801_v15 = vadd.f32 %v1800_v13, %v3041_v53  ;;  %v1732_v1 = vadd.f32 %v1731_v14, %v3041_v53  ;;  %v1802_v16 = vpop.f32.mrb[15].mxu1 }
 0x1cc   : > { %v1833_v17 = vmax.f32 %v1730_v12, 0.0  ;;  %v1803_v18 = vadd.f32 %v1802_v16, %v3041_v53 }
 0x1cd   : > { %v1835_v19 = vmax.f32 %v1801_v15, 0.0  ;;  %v1834_v20 = vmax.f32 %v1732_v1, 0.0 }
 0x1ce   : > { %1865 = vst [vmem:[%s3048_s29 + $0xe0] sm:$0xff] %v1833_v17  ;;  %v1836_v21 = vmax.f32 %v1803_v18, 0.0 }
 0x1cf   : > { %1867 = vst [vmem:[%s3048_s29 + $0xf0] sm:$0xff] %v1835_v19  ;;  %1866 = vst [vmem:[%s3048_s29 + $0xe8] sm:$0xff] %v1834_v20 }
 0x1d0   : > { %1868 = vst [vmem:[%s3048_s29 + $0xf8] sm:$0xff] %v1836_v21 }
 0x1d1 PF: > { %s13_s14 = sadd.s32 1, %s2482_s14   ;;  %s3126_s12 = smov %s2478_s13 }
 0x1d2   : > { %p10_p5 = scmp.ge.s32.totalorder %s13_s14, 4   ;;  %s3127_s13 = smov %s3129_s15 }
 0x1d4   :  { %12 = sbr.rel (!%p10_p5) target bundleno = 2 (0x2), region = 62 }

</bundles_post_ra>
